<compile_context>
chip_gen: v5e
topology: v5e:2x2
jax: 0.10.0
libtpu: 0.0.40
codegen_flags: <defaults>
</compile_context>

<pallas_src>
import math
import numpy as np

import jax
import jax.numpy as jnp
from jax.experimental import pallas as pl
from jax.experimental.pallas import tpu as pltpu

# ---- static config: PRISM(input_channels=64, n_classes=10) -------------------
INPUT_CHANNELS = 64
N_CLASSES = 10
KERNEL_SIZE = math.ceil(INPUT_CHANNELS / 9)          # 8
POOL_SIZE = math.ceil(KERNEL_SIZE / 5)               # 2
CONV_OUT = 20                                        # nn.Conv1d(1, 20, k)
L_CONV = INPUT_CHANNELS - KERNEL_SIZE + 1            # 57 (valid conv, stride 1)
P_POOL = L_CONV // POOL_SIZE                         # 28 (MaxPool1d floor mode)
FEATURES = CONV_OUT * P_POOL                         # 560  (= features_size)
HIDDEN = 100
BATCH = 4

# lane-aligned padded sizes (zero-padded; padding is inert end-to-end)
F_PAD = 640                                          # 5 * 128  >= 560
H_PAD = 128                                          # >= 100
C_PAD = 128                                          # >= 10


def _round_up(n, m):
    return ((n + m - 1) // m) * m


# ---- Pallas kernel ------------------------------------------------------------
def make_prism_kernel(bf16_tanh):
    def prism_kernel(x_ref, weff_ref, bconv_ref, w1_ref, b1_ref, w2_ref, b2_ref,
                     out_ref):
        # x: (TB, C) bf16 activations; weights bf16; accumulation f32 on the MXU.
        x = x_ref[...]

        # fused conv+pool: single matmul against the concatenated Toeplitz weights,
        # then a lane-aligned max over the POOL_SIZE halves (split at 640 = 5*128).
        acc = jnp.dot(x, weff_ref[...], preferred_element_type=jnp.float32)  # (TB, 2*F_PAD)
        pooled = jnp.maximum(acc[:, :F_PAD], acc[:, F_PAD:])                 # (TB, F_PAD)

        pre1 = pooled + bconv_ref[...]                                       # pool(conv)+b
        if bf16_tanh:
            h = jnp.tanh(pre1.astype(jnp.bfloat16))                          # packed bf16 EUP
        else:
            h = jnp.tanh(pre1).astype(jnp.bfloat16)

        pre2 = jnp.dot(h, w1_ref[...], preferred_element_type=jnp.float32) + b1_ref[...]
        if bf16_tanh:
            h2 = jnp.tanh(pre2.astype(jnp.bfloat16))
        else:
            h2 = jnp.tanh(pre2).astype(jnp.bfloat16)

        out_ref[...] = jnp.dot(h2, w2_ref[...],
                               preferred_element_type=jnp.float32) + b2_ref[...]
    return prism_kernel


def prism_forward(x4d, kernel_params, *, max_tile_b=512):
    """x4d: (B, C, 1, 1) like the PyTorch module's NCHW input with H=W=1."""
    b = x4d.shape[0]
    # squeeze/unsqueeze glue + pre-cast activations to bf16 (halves x DMA bytes)
    x = x4d.reshape(b, INPUT_CHANNELS).astype(jnp.bfloat16)

    # chip detection for the bf16-tanh / 2-TC sharding decisions
    try:
        kind = jax.devices()[0].device_kind.lower()
    except Exception:  # pragma: no cover
        kind = ""
    is_v5 = "v5" in kind
    multi_tc = "v7" in kind          # v7x: 2 TensorCores per chip

    # batch tile: multiple of 16 (bf16 sublane packing); big tiles amortize the
    # ~0.35us per-grid-step overhead; on v7x keep >=2 grid steps when batch allows
    # so the "parallel" axis actually shards over both cores.
    b_align = _round_up(b, 16)
    want = _round_up(-(-b_align // 2), 16) if multi_tc else b_align
    tb = max(16, min(max_tile_b, want))
    b_pad = _round_up(b, tb)
    if b_pad != b:
        x = jnp.pad(x, ((0, b_pad - b), (0, 0)))

    weff, bconv, w1t, b1, w2t, b2 = kernel_params

    flops = 2 * b_pad * (INPUT_CHANNELS * POOL_SIZE * F_PAD
                         + F_PAD * H_PAD + H_PAD * C_PAD)
    bytes_accessed = (x.size * 2 + b_pad * C_PAD * 4
                      + weff.size * 2 + w1t.size * 2 + w2t.size * 2
                      + (bconv.size + b1.size + b2.size) * 4)
    cost = pl.CostEstimate(flops=flops,
                           transcendentals=b_pad * (F_PAD + H_PAD),
                           bytes_accessed=bytes_accessed)

    def run(use_buffered, bf16_tanh):
        if use_buffered:
            def resident(shape):
                # constant index_map -> fetched once, stays VMEM-resident; single buffer.
                return pl.BlockSpec(shape, lambda i: (0, 0),
                                    pipeline_mode=pl.Buffered(1))
        else:
            def resident(shape):
                return pl.BlockSpec(shape, lambda i: (0, 0))

        return pl.pallas_call(
            make_prism_kernel(bf16_tanh),
            out_shape=jax.ShapeDtypeStruct((b_pad, C_PAD), jnp.float32),
            grid=(b_pad // tb,),
            in_specs=[
                pl.BlockSpec((tb, INPUT_CHANNELS), lambda i: (i, 0)),   # streamed per tile
                resident((INPUT_CHANNELS, POOL_SIZE * F_PAD)),
                resident((1, F_PAD)),
                resident((F_PAD, H_PAD)),
                resident((1, H_PAD)),
                resident((H_PAD, C_PAD)),
                resident((1, C_PAD)),
            ],
            out_specs=pl.BlockSpec((tb, C_PAD), lambda i: (i, 0)),
            compiler_params=pltpu.CompilerParams(
                dimension_semantics=("parallel",)),
            cost_estimate=cost,
        )(x, weff, bconv, w1t, b1, w2t, b2)

    try:
        out = jax.block_until_ready(run(True, not is_v5))
    except Exception:
        # conservative fallback: double-buffered residents, f32 tanh
        out = jax.block_until_ready(run(False, False))

    return out[:b, :N_CLASSES]


# ---- deterministic parameter init (mirrors PRISM.weight_init) ------------------
def init_params(key):
    k1, k2, k3 = jax.random.split(key, 3)
    w_conv = jax.random.uniform(k1, (CONV_OUT, KERNEL_SIZE), jnp.float32, -0.05, 0.05)
    b_conv = jnp.zeros((CONV_OUT,), jnp.float32)
    w1 = jax.random.uniform(k2, (HIDDEN, FEATURES), jnp.float32, -0.05, 0.05)
    b1 = jnp.zeros((HIDDEN,), jnp.float32)
    w2 = jax.random.uniform(k3, (N_CLASSES, HIDDEN), jnp.float32, -0.05, 0.05)
    b2 = jnp.zeros((N_CLASSES,), jnp.float32)
    return w_conv, b_conv, w1, b1, w2, b2


def build_kernel_params(w_conv, b_conv, w1, b1, w2, b2):
    """Fold Conv1d weights into POOL_SIZE Toeplitz matrices (host-side glue),
    pad to lane-aligned shapes, concatenate pooling offsets on the lane axis,
    and cast matmul weights to bf16 (biases stay f32).

    Column ordering of the fused conv/pool output is o*P_POOL + p, matching the
    PyTorch flatten x.view(-1, features_size) of a (B, 20, P) tensor.  Adding the
    conv bias after the max is valid (max(x+c) = max(x)+c per channel).
    """
    wc = np.asarray(jax.device_get(w_conv))                         # (20, k)
    weff = np.zeros((POOL_SIZE, INPUT_CHANNELS, CONV_OUT, P_POOL), np.float32)
    for s in range(POOL_SIZE):
        for p in range(P_POOL):
            start = p * POOL_SIZE + s
            weff[s, start:start + KERNEL_SIZE, :, p] = wc.T         # (k, 20)
    weff = weff.reshape(POOL_SIZE, INPUT_CHANNELS, FEATURES)

    # pad FEATURES -> F_PAD and concatenate the pooling offsets along lanes
    weff_pad = np.zeros((POOL_SIZE, INPUT_CHANNELS, F_PAD), np.float32)
    weff_pad[:, :, :FEATURES] = weff
    weff_cat = np.concatenate([weff_pad[s] for s in range(POOL_SIZE)],
                              axis=1)                               # (C, POOL*F_PAD)

    bconv_p = np.zeros((1, F_PAD), np.float32)
    bconv_p[0, :FEATURES] = np.repeat(np.asarray(jax.device_get(b_conv)), P_POOL)

    w1_np = np.asarray(jax.device_get(w1))                          # (100, 560)
    w1t = np.zeros((F_PAD, H_PAD), np.float32)
    w1t[:FEATURES, :HIDDEN] = w1_np.T
    b1_p = np.zeros((1, H_PAD), np.float32)
    b1_p[0, :HIDDEN] = np.asarray(jax.device_get(b1))

    w2_np = np.asarray(jax.device_get(w2))                          # (10, 100)
    w2t = np.zeros((H_PAD, C_PAD), np.float32)
    w2t[:HIDDEN, :N_CLASSES] = w2_np.T
    b2_p = np.zeros((1, C_PAD), np.float32)
    b2_p[0, :N_CLASSES] = np.asarray(jax.device_get(b2))

    return (jnp.asarray(weff_cat, jnp.bfloat16),
            jnp.asarray(bconv_p, jnp.float32),
            jnp.asarray(w1t, jnp.bfloat16),
            jnp.asarray(b1_p, jnp.float32),
            jnp.asarray(w2t, jnp.bfloat16),
            jnp.asarray(b2_p, jnp.float32))


# ---- pure-JAX reference for correctness check ----------------------------------
def reference(x4d, w_conv, b_conv, w1, b1, w2, b2):
    b = x4d.shape[0]
    x = x4d.reshape(b, 1, INPUT_CHANNELS)
    conv = jax.lax.conv_general_dilated(
        x, w_conv[:, None, :], window_strides=(1,), padding="VALID",
        dimension_numbers=("NCH", "OIH", "NCH")) + b_conv[None, :, None]
    pooled = conv[:, :, :P_POOL * POOL_SIZE].reshape(
        b, CONV_OUT, P_POOL, POOL_SIZE).max(-1)
    h = jnp.tanh(pooled).reshape(b, FEATURES)
    h = jnp.tanh(h @ w1.T + b1)
    return h @ w2.T + b2


if __name__ == "__main__":
    key = jax.random.PRNGKey(0)
    pkey, xkey = jax.random.split(key)

    raw_params = init_params(pkey)
    kernel_params = build_kernel_params(*raw_params)

    # input matches the PyTorch forward's expectation: (B, C, 1, 1)
    x = jax.random.normal(xkey, (BATCH, INPUT_CHANNELS, 1, 1), jnp.float32)

    out = prism_forward(x, kernel_params)
    out = jax.block_until_ready(out)
    assert out.shape == (BATCH, N_CLASSES)

    ref = reference(x, *raw_params)
    # bf16 weights/activations are an intentional quantization choice (~1% rel err)
    np.testing.assert_allclose(np.asarray(out), np.asarray(ref),
                               rtol=2e-2, atol=3e-3)
    print("KERNEL_OK")
</pallas_src>

<mosaic_0001>
module attributes {stable_mosaic.version = 11 : i64} {
  func.func @prism_kernel(%arg0: i32, %arg1: memref<16x64xbf16, #tpu.memory_space<vmem>>, %arg2: memref<64x1280xbf16, #tpu.memory_space<vmem>>, %arg3: memref<1x640xf32, #tpu.memory_space<vmem>>, %arg4: memref<640x128xbf16, #tpu.memory_space<vmem>>, %arg5: memref<1x128xf32, #tpu.memory_space<vmem>>, %arg6: memref<128x128xbf16, #tpu.memory_space<vmem>>, %arg7: memref<1x128xf32, #tpu.memory_space<vmem>>, %arg8: memref<16x128xf32, #tpu.memory_space<vmem>>) attributes {dimension_semantics = [#tpu.dimension_semantics<parallel>], iteration_bounds = array<i64: 1>, scalar_prefetch = 0 : i64, scratch_operands = 0 : i64, tpu.core_type = #tpu.core_type<tc>, window_params = [{transform_indices = @transform_0, window_bounds = array<i64: 16, 64>}, {pipeline_mode = #tpu.pipeline_mode<synchronous>, transform_indices = @transform_1, window_bounds = array<i64: 64, 1280>}, {pipeline_mode = #tpu.pipeline_mode<synchronous>, transform_indices = @transform_2, window_bounds = array<i64: 1, 640>}, {pipeline_mode = #tpu.pipeline_mode<synchronous>, transform_indices = @transform_3, window_bounds = array<i64: 640, 128>}, {pipeline_mode = #tpu.pipeline_mode<synchronous>, transform_indices = @transform_4, window_bounds = array<i64: 1, 128>}, {pipeline_mode = #tpu.pipeline_mode<synchronous>, transform_indices = @transform_5, window_bounds = array<i64: 128, 128>}, {pipeline_mode = #tpu.pipeline_mode<synchronous>, transform_indices = @transform_6, window_bounds = array<i64: 1, 128>}, {transform_indices = @transform_7, window_bounds = array<i64: 16, 128>}]} {
    %c0 = arith.constant 0 : index
    %c0_0 = arith.constant 0 : index
    %0 = vector.load %arg1[%c0, %c0_0] : memref<16x64xbf16, #tpu.memory_space<vmem>>, vector<16x64xbf16>
    %c0_1 = arith.constant 0 : index
    %c0_2 = arith.constant 0 : index
    %1 = vector.load %arg2[%c0_1, %c0_2] : memref<64x1280xbf16, #tpu.memory_space<vmem>>, vector<64x1280xbf16>
    %cst = arith.constant dense<0.000000e+00> : vector<16x1280xf32>
    %2 = tpu.matmul %0, %1, %cst {dimension_numbers = #tpu.dot_dimension_numbers<[1], [0], [0], [1], [0, 0, 1, 1], [], []>} : vector<16x64xbf16>, vector<64x1280xbf16>, vector<16x1280xf32> -> vector<16x1280xf32>
    %3 = vector.extract_strided_slice %2 {offsets = [0, 0], sizes = [16, 640], strides = [1, 1]} : vector<16x1280xf32> to vector<16x640xf32>
    %4 = vector.extract_strided_slice %2 {offsets = [0, 640], sizes = [16, 640], strides = [1, 1]} : vector<16x1280xf32> to vector<16x640xf32>
    %5 = arith.maximumf %3, %4 : vector<16x640xf32>
    %c0_3 = arith.constant 0 : index
    %c0_4 = arith.constant 0 : index
    %6 = vector.load %arg3[%c0_3, %c0_4] : memref<1x640xf32, #tpu.memory_space<vmem>>, vector<1x640xf32>
    %7 = vector.broadcast %6 : vector<1x640xf32> to vector<16x640xf32>
    %8 = arith.addf %5, %7 : vector<16x640xf32>
    %9 = arith.truncf %8 : vector<16x640xf32> to vector<16x640xbf16>
    %10 = math.tanh %9 : vector<16x640xbf16>
    %c0_5 = arith.constant 0 : index
    %c0_6 = arith.constant 0 : index
    %11 = vector.load %arg4[%c0_5, %c0_6] : memref<640x128xbf16, #tpu.memory_space<vmem>>, vector<640x128xbf16>
    %cst_7 = arith.constant dense<0.000000e+00> : vector<16x128xf32>
    %12 = tpu.matmul %10, %11, %cst_7 {dimension_numbers = #tpu.dot_dimension_numbers<[1], [0], [0], [1], [0, 0, 1, 1], [], []>} : vector<16x640xbf16>, vector<640x128xbf16>, vector<16x128xf32> -> vector<16x128xf32>
    %c0_8 = arith.constant 0 : index
    %c0_9 = arith.constant 0 : index
    %13 = vector.load %arg5[%c0_8, %c0_9] : memref<1x128xf32, #tpu.memory_space<vmem>>, vector<1x128xf32>
    %14 = vector.broadcast %13 : vector<1x128xf32> to vector<16x128xf32>
    %15 = arith.addf %12, %14 : vector<16x128xf32>
    %16 = arith.truncf %15 : vector<16x128xf32> to vector<16x128xbf16>
    %17 = math.tanh %16 : vector<16x128xbf16>
    %c0_10 = arith.constant 0 : index
    %c0_11 = arith.constant 0 : index
    %18 = vector.load %arg6[%c0_10, %c0_11] : memref<128x128xbf16, #tpu.memory_space<vmem>>, vector<128x128xbf16>
    %cst_12 = arith.constant dense<0.000000e+00> : vector<16x128xf32>
    %19 = tpu.matmul %17, %18, %cst_12 {dimension_numbers = #tpu.dot_dimension_numbers<[1], [0], [0], [1], [0, 0, 1, 1], [], []>} : vector<16x128xbf16>, vector<128x128xbf16>, vector<16x128xf32> -> vector<16x128xf32>
    %c0_13 = arith.constant 0 : index
    %c0_14 = arith.constant 0 : index
    %20 = vector.load %arg7[%c0_13, %c0_14] : memref<1x128xf32, #tpu.memory_space<vmem>>, vector<1x128xf32>
    %21 = vector.broadcast %20 : vector<1x128xf32> to vector<16x128xf32>
    %22 = arith.addf %19, %21 : vector<16x128xf32>
    %c0_15 = arith.constant 0 : index
    %c0_16 = arith.constant 0 : index
    %23 = vector.load %arg8[%c0_15, %c0_16] : memref<16x128xf32, #tpu.memory_space<vmem>>, vector<16x128xf32>
    tpu.vector_store %arg8[%c0_15, %c0_16], %22 {strides = array<i32>} : memref<16x128xf32, #tpu.memory_space<vmem>>, vector<16x128xf32>,
    return
  }
  func.func @transform_0(%arg0: i32) -> (i32, i32) {
    %c0_i32 = arith.constant 0 : i32
    %c0_i32_0 = arith.constant 0 : i32
    return %arg0, %c0_i32 : i32, i32
  }
  func.func @transform_1(%arg0: i32) -> (i32, i32) {
    %c0_i32 = arith.constant 0 : i32
    %c0_i32_0 = arith.constant 0 : i32
    %c0_i32_1 = arith.constant 0 : i32
    return %c0_i32, %c0_i32_0 : i32, i32
  }
  func.func @transform_2(%arg0: i32) -> (i32, i32) {
    %c0_i32 = arith.constant 0 : i32
    %c0_i32_0 = arith.constant 0 : i32
    %c0_i32_1 = arith.constant 0 : i32
    return %c0_i32, %c0_i32_0 : i32, i32
  }
  func.func @transform_3(%arg0: i32) -> (i32, i32) {
    %c0_i32 = arith.constant 0 : i32
    %c0_i32_0 = arith.constant 0 : i32
    %c0_i32_1 = arith.constant 0 : i32
    return %c0_i32, %c0_i32_0 : i32, i32
  }
  func.func @transform_4(%arg0: i32) -> (i32, i32) {
    %c0_i32 = arith.constant 0 : i32
    %c0_i32_0 = arith.constant 0 : i32
    %c0_i32_1 = arith.constant 0 : i32
    return %c0_i32, %c0_i32_0 : i32, i32
  }
  func.func @transform_5(%arg0: i32) -> (i32, i32) {
    %c0_i32 = arith.constant 0 : i32
    %c0_i32_0 = arith.constant 0 : i32
    %c0_i32_1 = arith.constant 0 : i32
    return %c0_i32, %c0_i32_0 : i32, i32
  }
  func.func @transform_6(%arg0: i32) -> (i32, i32) {
    %c0_i32 = arith.constant 0 : i32
    %c0_i32_0 = arith.constant 0 : i32
    %c0_i32_1 = arith.constant 0 : i32
    return %c0_i32, %c0_i32_0 : i32, i32
  }
  func.func @transform_7(%arg0: i32) -> (i32, i32) {
    %c0_i32 = arith.constant 0 : i32
    %c0_i32_0 = arith.constant 0 : i32
    return %arg0, %c0_i32 : i32, i32
  }
}

module attributes {stable_mosaic.version = 11 : i64} {
  func.func @prism_kernel(%arg0: i32, %arg1: memref<16x64xbf16, #tpu.memory_space<vmem>>, %arg2: memref<64x1280xbf16, #tpu.memory_space<vmem>>, %arg3: memref<1x640xf32, #tpu.memory_space<vmem>>, %arg4: memref<640x128xbf16, #tpu.memory_space<vmem>>, %arg5: memref<1x128xf32, #tpu.memory_space<vmem>>, %arg6: memref<128x128xbf16, #tpu.memory_space<vmem>>, %arg7: memref<1x128xf32, #tpu.memory_space<vmem>>, %arg8: memref<16x128xf32, #tpu.memory_space<vmem>>) attributes {dimension_semantics = [#tpu.dimension_semantics<parallel>], iteration_bounds = array<i64: 1>, scalar_prefetch = 0 : i64, scratch_operands = 0 : i64, tpu.core_type = #tpu.core_type<tc>, window_params = [{transform_indices = @transform_0, window_bounds = array<i64: 16, 64>}, {pipeline_mode = #tpu.pipeline_mode<synchronous>, transform_indices = @transform_1, window_bounds = array<i64: 64, 1280>}, {pipeline_mode = #tpu.pipeline_mode<synchronous>, transform_indices = @transform_2, window_bounds = array<i64: 1, 640>}, {pipeline_mode = #tpu.pipeline_mode<synchronous>, transform_indices = @transform_3, window_bounds = array<i64: 640, 128>}, {pipeline_mode = #tpu.pipeline_mode<synchronous>, transform_indices = @transform_4, window_bounds = array<i64: 1, 128>}, {pipeline_mode = #tpu.pipeline_mode<synchronous>, transform_indices = @transform_5, window_bounds = array<i64: 128, 128>}, {pipeline_mode = #tpu.pipeline_mode<synchronous>, transform_indices = @transform_6, window_bounds = array<i64: 1, 128>}, {transform_indices = @transform_7, window_bounds = array<i64: 16, 128>}]} {
    %c0 = arith.constant 0 : index
    %c0_0 = arith.constant 0 : index
    %0 = vector.load %arg1[%c0, %c0_0] : memref<16x64xbf16, #tpu.memory_space<vmem>>, vector<16x64xbf16>
    %c0_1 = arith.constant 0 : index
    %c0_2 = arith.constant 0 : index
    %1 = vector.load %arg2[%c0_1, %c0_2] : memref<64x1280xbf16, #tpu.memory_space<vmem>>, vector<64x1280xbf16>
    %cst = arith.constant dense<0.000000e+00> : vector<16x1280xf32>
    %2 = tpu.matmul %0, %1, %cst {dimension_numbers = #tpu.dot_dimension_numbers<[1], [0], [0], [1], [0, 0, 1, 1], [], []>} : vector<16x64xbf16>, vector<64x1280xbf16>, vector<16x1280xf32> -> vector<16x1280xf32>
    %3 = vector.extract_strided_slice %2 {offsets = [0, 0], sizes = [16, 640], strides = [1, 1]} : vector<16x1280xf32> to vector<16x640xf32>
    %4 = vector.extract_strided_slice %2 {offsets = [0, 640], sizes = [16, 640], strides = [1, 1]} : vector<16x1280xf32> to vector<16x640xf32>
    %5 = arith.maximumf %3, %4 : vector<16x640xf32>
    %c0_3 = arith.constant 0 : index
    %c0_4 = arith.constant 0 : index
    %6 = vector.load %arg3[%c0_3, %c0_4] : memref<1x640xf32, #tpu.memory_space<vmem>>, vector<1x640xf32>
    %7 = vector.broadcast %6 : vector<1x640xf32> to vector<16x640xf32>
    %8 = arith.addf %5, %7 : vector<16x640xf32>
    %9 = math.tanh %8 : vector<16x640xf32>
    %10 = arith.truncf %9 : vector<16x640xf32> to vector<16x640xbf16>
    %c0_5 = arith.constant 0 : index
    %c0_6 = arith.constant 0 : index
    %11 = vector.load %arg4[%c0_5, %c0_6] : memref<640x128xbf16, #tpu.memory_space<vmem>>, vector<640x128xbf16>
    %cst_7 = arith.constant dense<0.000000e+00> : vector<16x128xf32>
    %12 = tpu.matmul %10, %11, %cst_7 {dimension_numbers = #tpu.dot_dimension_numbers<[1], [0], [0], [1], [0, 0, 1, 1], [], []>} : vector<16x640xbf16>, vector<640x128xbf16>, vector<16x128xf32> -> vector<16x128xf32>
    %c0_8 = arith.constant 0 : index
    %c0_9 = arith.constant 0 : index
    %13 = vector.load %arg5[%c0_8, %c0_9] : memref<1x128xf32, #tpu.memory_space<vmem>>, vector<1x128xf32>
    %14 = vector.broadcast %13 : vector<1x128xf32> to vector<16x128xf32>
    %15 = arith.addf %12, %14 : vector<16x128xf32>
    %16 = math.tanh %15 : vector<16x128xf32>
    %17 = arith.truncf %16 : vector<16x128xf32> to vector<16x128xbf16>
    %c0_10 = arith.constant 0 : index
    %c0_11 = arith.constant 0 : index
    %18 = vector.load %arg6[%c0_10, %c0_11] : memref<128x128xbf16, #tpu.memory_space<vmem>>, vector<128x128xbf16>
    %cst_12 = arith.constant dense<0.000000e+00> : vector<16x128xf32>
    %19 = tpu.matmul %17, %18, %cst_12 {dimension_numbers = #tpu.dot_dimension_numbers<[1], [0], [0], [1], [0, 0, 1, 1], [], []>} : vector<16x128xbf16>, vector<128x128xbf16>, vector<16x128xf32> -> vector<16x128xf32>
    %c0_13 = arith.constant 0 : index
    %c0_14 = arith.constant 0 : index
    %20 = vector.load %arg7[%c0_13, %c0_14] : memref<1x128xf32, #tpu.memory_space<vmem>>, vector<1x128xf32>
    %21 = vector.broadcast %20 : vector<1x128xf32> to vector<16x128xf32>
    %22 = arith.addf %19, %21 : vector<16x128xf32>
    %c0_15 = arith.constant 0 : index
    %c0_16 = arith.constant 0 : index
    %23 = vector.load %arg8[%c0_15, %c0_16] : memref<16x128xf32, #tpu.memory_space<vmem>>, vector<16x128xf32>
    tpu.vector_store %arg8[%c0_15, %c0_16], %22 {strides = array<i32>} : memref<16x128xf32, #tpu.memory_space<vmem>>, vector<16x128xf32>,
    return
  }
  func.func @transform_0(%arg0: i32) -> (i32, i32) {
    %c0_i32 = arith.constant 0 : i32
    %c0_i32_0 = arith.constant 0 : i32
    return %arg0, %c0_i32 : i32, i32
  }
  func.func @transform_1(%arg0: i32) -> (i32, i32) {
    %c0_i32 = arith.constant 0 : i32
    %c0_i32_0 = arith.constant 0 : i32
    %c0_i32_1 = arith.constant 0 : i32
    return %c0_i32, %c0_i32_0 : i32, i32
  }
  func.func @transform_2(%arg0: i32) -> (i32, i32) {
    %c0_i32 = arith.constant 0 : i32
    %c0_i32_0 = arith.constant 0 : i32
    %c0_i32_1 = arith.constant 0 : i32
    return %c0_i32, %c0_i32_0 : i32, i32
  }
  func.func @transform_3(%arg0: i32) -> (i32, i32) {
    %c0_i32 = arith.constant 0 : i32
    %c0_i32_0 = arith.constant 0 : i32
    %c0_i32_1 = arith.constant 0 : i32
    return %c0_i32, %c0_i32_0 : i32, i32
  }
  func.func @transform_4(%arg0: i32) -> (i32, i32) {
    %c0_i32 = arith.constant 0 : i32
    %c0_i32_0 = arith.constant 0 : i32
    %c0_i32_1 = arith.constant 0 : i32
    return %c0_i32, %c0_i32_0 : i32, i32
  }
  func.func @transform_5(%arg0: i32) -> (i32, i32) {
    %c0_i32 = arith.constant 0 : i32
    %c0_i32_0 = arith.constant 0 : i32
    %c0_i32_1 = arith.constant 0 : i32
    return %c0_i32, %c0_i32_0 : i32, i32
  }
  func.func @transform_6(%arg0: i32) -> (i32, i32) {
    %c0_i32 = arith.constant 0 : i32
    %c0_i32_0 = arith.constant 0 : i32
    %c0_i32_1 = arith.constant 0 : i32
    return %c0_i32, %c0_i32_0 : i32, i32
  }
  func.func @transform_7(%arg0: i32) -> (i32, i32) {
    %c0_i32 = arith.constant 0 : i32
    %c0_i32_0 = arith.constant 0 : i32
    return %arg0, %c0_i32 : i32, i32
  }
}

</mosaic_0001>

<bundles_post_ra>
// kernel: tpu_custom_call.1
= control target key start
LH: loop header
LB: loop body
LE: loop exit
PB: predicated region body
PF: predicated region fallthrough
CT: control target
= control target key end

     0   :  { %12 = vsyncpa [#allocation3], 0  ;;  %s1823_s0 = inlined_call_operand.hbm [shape: bf16[16,64], index: 0, kind: input, shape index: {}]   ;;  %s1824_s1 = inlined_call_operand.hbm [shape: bf16[64,1280], index: 1, kind: input, shape index: {}]   ;;  %s1825_s2 = inlined_call_operand.hbm [shape: f32[1,640], index: 2, kind: input, shape index: {}]   ;;  %s1826_s3 = inlined_call_operand.hbm [shape: bf16[640,128], index: 3, kind: input, shape index: {}]   ;;  %s1827_s4 = inlined_call_operand.vmem [shape: f32[1,128], index: 4, kind: input, shape index: {}]   ;;  %s1828_s5 = inlined_call_operand.hbm [shape: bf16[128,128], index: 5, kind: input, shape index: {}]   ;;  %s1829_s6 = inlined_call_operand.vmem [shape: f32[1,128], index: 6, kind: input, shape index: {}]   ;;  %s1830_s7 = inlined_call_operand.hbm [shape: f32[16,128], index: 7, kind: output, shape index: {}]  }
   0x1   :  { %13 = vsyncpa [#allocation6], 0 }
   0x2   :  { %14 = vsyncpa [#allocation9], 0  ;;  %s33_s26 = sshll.u32 %s1824_s1, 4  ;;  %s34_s26 = int_to_ptr.hbm [resolvable:$true] %s33_s26 }
   0x3   :  { %15 = vsyncpa [#allocation4], 0  ;;  %s1707_s27 = smov [#allocation5]   ;;  %s1708_s29 = smov 640  }
   0x4   :  { %s35_s28 = sshll.u32 %s1707_s27, 4  ;;  %s1709_s30 = smov 40   ;;  %s36_s28 = int_to_ptr.vmem [resolvable:$true] %s35_s28 }
   0x5   :  { %41 = dma.hbm_to_vmem [thread:$0]  %s34_s26, 5120, %s36_s28, [#allocation6], %s1708_s29, %s1708_s29, %s1709_s30  }
   0x6   :  { %s57_s10 = sshll.u32 %s1826_s3, 4  ;;  %s1710_s11 = smov [#allocation8]   ;;  %s58_s10 = int_to_ptr.hbm [resolvable:$true] %s57_s10 }
   0x7   :  { %s59_s12 = sshll.u32 %s1710_s11, 4  ;;  %s20_s15 = sshll.u32 %s1823_s0, 4  ;;  %s60_s12 = int_to_ptr.vmem [resolvable:$true] %s59_s12  ;;  %s21_s15 = int_to_ptr.hbm [resolvable:$true] %s20_s15 }
   0x8   :  { %s1711_s1 = smov 64   ;;  %s1712_s16 = smov 4  }
   0x9   :  { %65 = dma.hbm_to_vmem [thread:$0]  %s58_s10, 5120, %s60_s12, [#allocation9], %s1711_s1, %s1711_s1, %s1712_s16  }
   0xa   :  { %s47_s19 = sshll.u32 %s1825_s2, 4  ;;  %s1713_s20 = smov [#allocation2]   ;;  %s48_s19 = int_to_ptr.hbm [resolvable:$true] %s47_s19 }
   0xb   :  { %s22_s21 = sshll.u32 %s1713_s20, 4  ;;  %s1714_s3 = smov [#allocation7]   ;;  %s23_s21 = int_to_ptr.vmem [resolvable:$true] %s22_s21 }
   0xc   :  { %28 = dma.hbm_to_vmem [thread:$0]  %s21_s15, 128, %s23_s21, [#allocation3], %s1711_s1, %s1711_s1, %s1712_s16  }
   0xd   :  { %s49_s22 = sshll.u32 %s1714_s3, 4  ;;  %s72_s0 = sshll.u32 %s1828_s5, 4  ;;  %s50_s22 = int_to_ptr.vmem [resolvable:$true] %s49_s22  ;;  %s73_s0 = int_to_ptr.hbm [resolvable:$true] %s72_s0 }
   0xe   :  { %52 = dma.hbm_to_vmem [thread:$0]  %s48_s19, 80, %s50_s22, [#allocation6]  }
   0xf   :  { %s1715_s25 = smov [#allocation10]  }
  0x10   :  { %s74_s26 = sshll.u32 %s1715_s25, 4  ;;  %s75_s26 = int_to_ptr.vmem [resolvable:$true] %s74_s26 }
  0x11   :  { %80 = dma.hbm_to_vmem [thread:$0]  %s73_s0, 1024, %s75_s26, [#allocation9], %s1711_s1, %s1711_s1, %s1712_s16  }
  0x12   :  { %1699 = dma.done.wait [#allocation3], 128  }
  0x13   :  { %1700 = vsyncadd [#allocation3], 4294967168 }
  0x14   :  { %1701 = dma.done.wait [#allocation6], 5200  }
  0x15   :  { %1702 = vsyncadd [#allocation6], 4294962096 }
  0x16   :  { %1703 = dma.done.wait [#allocation9], 6144  }
  0x17   :  { %1704 = vsyncadd [#allocation9], 4294961152  ;;  %v1188_v0 = vld [vmem:[#allocation5 + $0xf0] sm:$0xf]  ;;  %v1464_v1 = vld [vmem:[#allocation5 + $0x114] sm:$0xf0] }
  0x18   :  { %v1459_v2 = vld [vmem:[#allocation5 + $0xf4] sm:$0xf]  ;;  %v1189_v3 = vor.u32 %v1464_v1, %v1188_v0  ;;  %v1190_v4 = vld [vmem:[#allocation5 + $0x118] sm:$0xf0]  ;;  %v1196_v5 = vld [vmem:[#allocation5 + $0xf8] sm:$0xf] }
  0x19   :  { %v1465_v6 = vld [vmem:[#allocation5 + $0x11c] sm:$0xf0]  ;;  %v1193_v7 = vor.u32 %v1459_v2, %v1190_v4  ;;  %v1460_v9 = vld [vmem:[#allocation5 + $0xfc] sm:$0xf]  ;;  %v1198_v10 = vld [vmem:[#allocation5 + $0x120] sm:$0xf0] }
  0x1a   :  { %v1197_v8 = vor.u32 %v1465_v6, %v1196_v5  ;;  %v1148_v11 = vld [vmem:[#allocation5 + $0xa0] sm:$0xf]  ;;  %359 = vmatpush.bf16.msra.mxu0 %v1189_v3  ;;  %v1201_v12 = vor.u32 %v1460_v9, %v1198_v10  ;;  %v1454_v13 = vld [vmem:[#allocation5 + $0xc4] sm:$0xf0]  ;;  %v1449_v14 = vld [vmem:[#allocation5 + $0xa4] sm:$0xf] }
  0x1b   :  { %v1150_v15 = vld [vmem:[#allocation5 + $0xc8] sm:$0xf0]  ;;  %373 = vmatpush.bf16.msra.mxu1 %v1193_v7  ;;  %v1149_v16 = vor.u32 %v1454_v13, %v1148_v11  ;;  %v1156_v18 = vld [vmem:[#allocation5 + $0xa8] sm:$0xf]  ;;  %v1455_v19 = vld [vmem:[#allocation5 + $0xcc] sm:$0xf0] }
  0x1c   :  { %387 = vmatpush.bf16.msra.mxu2 %v1197_v8  ;;  %v1153_v17 = vor.u32 %v1449_v14, %v1150_v15  ;;  %v1450_v20 = vld [vmem:[#allocation5 + $0xac] sm:$0xf]  ;;  %401 = vmatpush.bf16.msra.mxu3 %v1201_v12  ;;  %v1157_v21 = vor.u32 %v1455_v19, %v1156_v18  ;;  %v1158_v22 = vld [vmem:[#allocation5 + $0xd0] sm:$0xf0]  ;;  %v1108_v23 = vld [vmem:[#allocation5 + $0x50] sm:$0xf] }
  0x1d   :  { %v1444_v24 = vld [vmem:[#allocation5 + $0x74] sm:$0xf0]  ;;  %v1161_v25 = vor.u32 %v1450_v20, %v1158_v22  ;;  %v1439_v26 = vld [vmem:[#allocation5 + $0x54] sm:$0xf]  ;;  %v1110_v27 = vld [vmem:[#allocation5 + $0x78] sm:$0xf0] }
  0x1e   :  { %v1116_v28 = vld [vmem:[#allocation5 + $0x58] sm:$0xf]  ;;  %360 = vmatpush.bf16.msra.mxu0 %v1149_v16  ;;  %v1109_v29 = vor.u32 %v1444_v24, %v1108_v23  ;;  %v1445_v30 = vld [vmem:[#allocation5 + $0x7c] sm:$0xf0]  ;;  %v1440_v31 = vld [vmem:[#allocation5 + $0x5c] sm:$0xf]  ;;  %v1113_v33 = vor.u32 %v1439_v26, %v1110_v27 }
  0x1f   :  { %v1118_v32 = vld [vmem:[#allocation5 + $0x80] sm:$0xf0]  ;;  %374 = vmatpush.bf16.msra.mxu1 %v1153_v17  ;;  %v1117_v34 = vor.u32 %v1445_v30, %v1116_v28  ;;  %v1068_v35 = vld [vmem:[#allocation5] sm:$0xf]  ;;  %v1434_v36 = vld [vmem:[#allocation5 + $0x24] sm:$0xf0] }
  0x20   :  { %388 = vmatpush.bf16.msra.mxu2 %v1157_v21  ;;  %v1429_v37 = vld [vmem:[#allocation5 + $0x4] sm:$0xf]  ;;  %402 = vmatpush.bf16.msra.mxu3 %v1161_v25  ;;  %v1121_v38 = vor.u32 %v1440_v31, %v1118_v32  ;;  %v1070_v39 = vld [vmem:[#allocation5 + $0x28] sm:$0xf0]  ;;  %v1076_v40 = vld [vmem:[#allocation5 + $0x8] sm:$0xf]  ;;  %v1069_v44 = vor.u32 %v1434_v36, %v1068_v35 }
  0x21   :  { %v1435_v41 = vld [vmem:[#allocation5 + $0x2c] sm:$0xf0]  ;;  %v1430_v42 = vld [vmem:[#allocation5 + $0xc] sm:$0xf]  ;;  %v1078_v43 = vld [vmem:[#allocation5 + $0x30] sm:$0xf0]  ;;  %v1073_v47 = vor.u32 %v1429_v37, %v1070_v39 }
  0x22   :  { %361 = vmatpush.bf16.msra.mxu0 %v1109_v29  ;;  %v1461_v45 = vld [vmem:[#allocation5 + $0x104] sm:$0xf]  ;;  %v1206_v46 = vld [vmem:[#allocation5 + $0x128] sm:$0xf0]  ;;  %v1077_v48 = vor.u32 %v1435_v41, %v1076_v40  ;;  %v1774_v49 = vld [vmem:[#allocation2] sm:$0xff]  ;;  %v1081_v52 = vor.u32 %v1430_v42, %v1078_v43  ;;  %vm351_vm0 = vcmask 523264  }
  0x23   :  { %375 = vmatpush.bf16.msra.mxu1 %v1113_v33  ;;  %v1212_v50 = vld [vmem:[#allocation5 + $0x108] sm:$0xf]  ;;  %v1467_v51 = vld [vmem:[#allocation5 + $0x12c] sm:$0xf0]  ;;  %v1209_v53 = vor.u32 %v1461_v45, %v1206_v46  ;;  %v1204_v54 = vld [vmem:[#allocation5 + $0x100] sm:$0xf] }
  0x24   :  { %389 = vmatpush.bf16.msra.mxu2 %v1117_v34  ;;  %403 = vmatpush.bf16.msra.mxu3 %v1121_v38  ;;  %v1466_v55 = vld [vmem:[#allocation5 + $0x124] sm:$0xf0]  ;;  %v1462_v56 = vld [vmem:[#allocation5 + $0x10c] sm:$0xf]  ;;  %v1213_v57 = vor.u32 %v1467_v51, %v1212_v50  ;;  %v1214_v58 = vld [vmem:[#allocation5 + $0x130] sm:$0xf0] }
  0x25   :  { %v1451_v59 = vld [vmem:[#allocation5 + $0xb4] sm:$0xf]  ;;  %v1166_v60 = vld [vmem:[#allocation5 + $0xd8] sm:$0xf0]  ;;  %v1172_v61 = vld [vmem:[#allocation5 + $0xb8] sm:$0xf]  ;;  %v1205_v63 = vor.u32 %v1466_v55, %v1204_v54  ;;  %v1217_v0 = vor.u32 %v1462_v56, %v1214_v58 }
  0x26   :  { %362 = vmatpush.bf16.msra.mxu0 %v1069_v44  ;;  %v1457_v62 = vld [vmem:[#allocation5 + $0xdc] sm:$0xf0]  ;;  %v1169_v1 = vor.u32 %v1451_v59, %v1166_v60  ;;  %v1164_v2 = vld [vmem:[#allocation5 + $0xb0] sm:$0xf]  ;;  %v1456_v3 = vld [vmem:[#allocation5 + $0xd4] sm:$0xf0] }
  0x27   :  { %376 = vmatpush.bf16.msra.mxu1 %v1073_v47  ;;  %v1452_v4 = vld [vmem:[#allocation5 + $0xbc] sm:$0xf]  ;;  %v1173_v5 = vor.u32 %v1457_v62, %v1172_v61  ;;  %v1174_v6 = vld [vmem:[#allocation5 + $0xe0] sm:$0xf0]  ;;  %v1126_v8 = vld [vmem:[#allocation5 + $0x88] sm:$0xf0]  ;;  %v1165_v11 = vor.u32 %v1456_v3, %v1164_v2 }
  0x28   :  { %390 = vmatpush.bf16.msra.mxu2 %v1077_v48  ;;  %404 = vmatpush.bf16.msra.mxu3 %v1081_v52  ;;  %v1441_v7 = vld [vmem:[#allocation5 + $0x64] sm:$0xf]  ;;  %v1132_v9 = vld [vmem:[#allocation5 + $0x68] sm:$0xf]  ;;  %v1447_v10 = vld [vmem:[#allocation5 + $0x8c] sm:$0xf0]  ;;  %v1177_v13 = vor.u32 %v1452_v4, %v1174_v6 }
  0x29   :  { %1226 = vmatmul.msk.bf16.vlgmr.msra.gmra.mxu0 %vm351_vm0, %v1774_v49  ;;  %v1124_v12 = vld [vmem:[#allocation5 + $0x60] sm:$0xf]  ;;  %v1129_v14 = vor.u32 %v1441_v7, %v1126_v8  ;;  %v1446_v15 = vld [vmem:[#allocation5 + $0x84] sm:$0xf0]  ;;  %v1442_v16 = vld [vmem:[#allocation5 + $0x6c] sm:$0xf]  ;;  %v1133_v18 = vor.u32 %v1447_v10, %v1132_v9 }
  0x2a   :  { %1227 = vmatmul.msk.bf16.vlgmr.msra.gmra.mxu1 %vm351_vm0, %v1774_v49  ;;  %415 = vmatpush.bf16.msrb.mxu0 %v1205_v63  ;;  %v1134_v17 = vld [vmem:[#allocation5 + $0x90] sm:$0xf0]  ;;  %v1086_v20 = vld [vmem:[#allocation5 + $0x38] sm:$0xf0]  ;;  %v1092_v21 = vld [vmem:[#allocation5 + $0x18] sm:$0xf]  ;;  %v1125_v25 = vor.u32 %v1446_v15, %v1124_v12 }
  0x2b   :  { %429 = vmatpush.bf16.msrb.mxu1 %v1209_v53  ;;  %1228 = vmatmul.msk.bf16.vlgmr.msra.gmra.mxu2 %vm351_vm0, %v1774_v49  ;;  %v1431_v19 = vld [vmem:[#allocation5 + $0x14] sm:$0xf]  ;;  %v1437_v22 = vld [vmem:[#allocation5 + $0x3c] sm:$0xf0]  ;;  %v1222_v24 = vld [vmem:[#allocation5 + $0x138] sm:$0xf0]  ;;  %v1137_v28 = vor.u32 %v1442_v16, %v1134_v17 }
  0x2c   :  { %443 = vmatpush.bf16.msrb.mxu2 %v1213_v57  ;;  %1229 = vmatmul.msk.bf16.vlgmr.msra.gmra.mxu3 %vm351_vm0, %v1774_v49  ;;  %v1463_v23 = vld [vmem:[#allocation5 + $0x114] sm:$0xf]  ;;  %v1084_v26 = vld [vmem:[#allocation5 + $0x10] sm:$0xf]  ;;  %v1436_v27 = vld [vmem:[#allocation5 + $0x34] sm:$0xf0]  ;;  %v1089_v29 = vor.u32 %v1431_v19, %v1086_v20  ;;  %v1093_v33 = vor.u32 %v1437_v22, %v1092_v21 }
  0x2d   :  { %457 = vmatpush.bf16.msrb.mxu3 %v1217_v0  ;;  %v1432_v30 = vld [vmem:[#allocation5 + $0x1c] sm:$0xf]  ;;  %v1094_v31 = vld [vmem:[#allocation5 + $0x40] sm:$0xf0]  ;;  %v1220_v32 = vld [vmem:[#allocation5 + $0x110] sm:$0xf]  ;;  %v1225_v34 = vor.u32 %v1463_v23, %v1222_v24  ;;  %v1085_v39 = vor.u32 %v1436_v27, %v1084_v26 }
  0x2e   :  { %416 = vmatpush.bf16.msrb.mxu0 %v1165_v11  ;;  %v1468_v35 = vld [vmem:[#allocation5 + $0x134] sm:$0xf0]  ;;  %v1453_v36 = vld [vmem:[#allocation5 + $0xc4] sm:$0xf]  ;;  %v1182_v37 = vld [vmem:[#allocation5 + $0xe8] sm:$0xf0]  ;;  %v1097_v40 = vor.u32 %v1432_v30, %v1094_v31 }
  0x2f   :  { %430 = vmatpush.bf16.msrb.mxu1 %v1169_v1  ;;  %v1476_v38 = vld [vmem:[#allocation8 + $0x38] sm:$0xff]  ;;  %v1221_v41 = vor.u32 %v1468_v35, %v1220_v32  ;;  %v1185_v42 = vor.u32 %v1453_v36, %v1182_v37  ;;  %v1458_v44 = vld [vmem:[#allocation5 + $0xe4] sm:$0xf0]  ;;  %v1443_v45 = vld [vmem:[#allocation5 + $0x74] sm:$0xf]  ;;  %s1716_s28 = smov [#allocation11]  }
  0x30   :  { %444 = vmatpush.bf16.msrb.mxu2 %v1173_v5  ;;  %v1180_v43 = vld [vmem:[#allocation5 + $0xc0] sm:$0xf]  ;;  %v1142_v46 = vld [vmem:[#allocation5 + $0x98] sm:$0xf0]  ;;  %v1140_v50 = vld [vmem:[#allocation5 + $0x70] sm:$0xf] }
  0x31   :  { %458 = vmatpush.bf16.msrb.mxu3 %v1177_v13  ;;  %v1181_v47 = vor.u32 %v1458_v44, %v1180_v43  ;;  %v1145_v48 = vor.u32 %v1443_v45, %v1142_v46  ;;  %v1448_v51 = vld [vmem:[#allocation5 + $0x94] sm:$0xf0]  ;;  %v1433_v52 = vld [vmem:[#allocation5 + $0x24] sm:$0xf]  ;;  %v1102_v53 = vld [vmem:[#allocation5 + $0x48] sm:$0xf0] }
  0x32   :  { %417 = vmatpush.bf16.msrb.mxu0 %v1125_v25  ;;  %v1141_v54 = vor.u32 %v1448_v51, %v1140_v50  ;;  %v1105_v55 = vor.u32 %v1433_v52, %v1102_v53  ;;  %v1100_v56 = vld [vmem:[#allocation5 + $0x20] sm:$0xf]  ;;  %v1438_v57 = vld [vmem:[#allocation5 + $0x44] sm:$0xf0]  ;;  %v1475_v59 = vld [vmem:[#allocation8 + $0x30] sm:$0xff]  ;;  %s1045_s29 = sshll.u32 %s1716_s28, 4  ;;  %s1046_s29 = int_to_ptr.vmem [resolvable:$true] %s1045_s29 }
  0x33   :  { %431 = vmatpush.bf16.msrb.mxu1 %v1129_v14  ;;  %v1101_v58 = vor.u32 %v1438_v57, %v1100_v56  ;;  %v1474_v60 = vld [vmem:[#allocation8 + $0x28] sm:$0xff]  ;;  %v1473_v61 = vld [vmem:[#allocation8 + $0x20] sm:$0xff]  ;;  %v1472_v62 = vld [vmem:[#allocation8 + $0x18] sm:$0xff]  ;;  %s1047_s9 = sshll.u32 %s1830_s7, 4  ;;  %s1717_s10 = smov 128   ;;  %s1048_s9 = int_to_ptr.hbm [resolvable:$true] %s1047_s9 }
  0x34   :  { %445 = vmatpush.bf16.msrb.mxu2 %v1133_v18  ;;  %v1484_v63 = vld [vmem:[#allocation8 + $0x78] sm:$0xff]  ;;  %v1471_v1 = vld [vmem:[#allocation8 + $0x10] sm:$0xff]  ;;  %v1470_v4 = vld [vmem:[#allocation8 + $0x8] sm:$0xff]  ;;  %s1718_s11 = smov 8  }
  0x35   :  { %459 = vmatpush.bf16.msrb.mxu3 %v1137_v28  ;;  %v1492_v0 = vld [vmem:[#allocation8 + $0xb8] sm:$0xff]  ;;  %v1483_v2 = vld [vmem:[#allocation8 + $0x70] sm:$0xff]  ;;  %v1490_v5 = vld [vmem:[#allocation8 + $0xa8] sm:$0xff] }
  0x36   :  { %418 = vmatpush.bf16.msrb.mxu0 %v1085_v39  ;;  %v1491_v3 = vld [vmem:[#allocation8 + $0xb0] sm:$0xff]  ;;  %v1469_v6 = vld [vmem:[#allocation8] sm:$0xff]  ;;  %v1500_v7 = vld [vmem:[#allocation8 + $0xf8] sm:$0xff] }
  0x37   :  { %432 = vmatpush.bf16.msrb.mxu1 %v1089_v29  ;;  %v1508_v8 = vld [vmem:[#allocation8 + $0x138] sm:$0xff]  ;;  %v1481_v9 = vld [vmem:[#allocation8 + $0x60] sm:$0xff]  ;;  %v1499_v13 = vld [vmem:[#allocation8 + $0xf0] sm:$0xff] }
  0x38   :  { %446 = vmatpush.bf16.msrb.mxu2 %v1093_v33  ;;  %v1489_v10 = vld [vmem:[#allocation8 + $0xa0] sm:$0xff]  ;;  %v1507_v14 = vld [vmem:[#allocation8 + $0x130] sm:$0xff]  ;;  %v1480_v15 = vld [vmem:[#allocation8 + $0x58] sm:$0xff] }
  0x39   :  { %460 = vmatpush.bf16.msrb.mxu3 %v1097_v40  ;;  %1230 = vmatmul.msk.bf16.vlgmr.msrb.gmra.mxu0 %vm351_vm0, %v1774_v49  ;;  %v1488_v16 = vld [vmem:[#allocation8 + $0x98] sm:$0xff]  ;;  %v1498_v17 = vld [vmem:[#allocation8 + $0xe8] sm:$0xff]  ;;  %v1479_v22 = vld [vmem:[#allocation8 + $0x50] sm:$0xff] }
  0x3a   :  { %471 = vmatpush.bf16.msra.mxu0 %v1221_v41  ;;  %1231 = vmatmul.msk.bf16.vlgmr.msrb.gmra.mxu1 %vm351_vm0, %v1774_v49  ;;  %v1506_v18 = vld [vmem:[#allocation8 + $0x128] sm:$0xff]  ;;  %v1487_v23 = vld [vmem:[#allocation8 + $0x90] sm:$0xff]  ;;  %v1497_v25 = vld [vmem:[#allocation8 + $0xe0] sm:$0xff] }
  0x3b   :  { %485 = vmatpush.bf16.msra.mxu1 %v1225_v34  ;;  %1232 = vmatmul.msk.bf16.vlgmr.msrb.gmra.mxu2 %vm351_vm0, %v1774_v49  ;;  %v1505_v26 = vld [vmem:[#allocation8 + $0x120] sm:$0xff]  ;;  %v1478_v27 = vld [vmem:[#allocation8 + $0x48] sm:$0xff]  ;;  %v1496_v29 = vld [vmem:[#allocation8 + $0xd8] sm:$0xff] }
  0x3c   :  { %881 = vmatpush.bf16.msra.mxu2 %v1476_v38  ;;  %1233 = vmatmul.msk.bf16.vlgmr.msrb.gmra.mxu3 %vm351_vm0, %v1774_v49  ;;  %v1486_v28 = vld [vmem:[#allocation8 + $0x88] sm:$0xff]  ;;  %v1504_v30 = vld [vmem:[#allocation8 + $0x118] sm:$0xff]  ;;  %v1477_v33 = vld [vmem:[#allocation8 + $0x40] sm:$0xff] }
  0x3d   :  { %895 = vmatpush.bf16.msra.mxu3 %v1484_v63  ;;  %v1485_v34 = vld [vmem:[#allocation8 + $0x80] sm:$0xff]  ;;  %v1495_v37 = vld [vmem:[#allocation8 + $0xd0] sm:$0xff]  ;;  %v505_v39 = vld [vmem:[#allocation7] sm:$0x1f] }
  0x3e   :  { %472 = vmatpush.bf16.msra.mxu0 %v1181_v47  ;;  %v1503_v38 = vld [vmem:[#allocation8 + $0x110] sm:$0xff]  ;;  %v1494_v40 = vld [vmem:[#allocation8 + $0xc8] sm:$0xff]  ;;  %v507_v43 = vperm.slane %v505_v39, 0  ;;  %v1493_v46 = vld [vmem:[#allocation8 + $0xc0] sm:$0xff] }
  0x3f   :  { %486 = vmatpush.bf16.msra.mxu1 %v1185_v42  ;;  %v1502_v41 = vld [vmem:[#allocation8 + $0x108] sm:$0xff]  ;;  %v1501_v47 = vld [vmem:[#allocation8 + $0x100] sm:$0xff] }
  0x40   :  { %882 = vmatpush.bf16.msra.mxu2 %v1475_v59 }
  0x41   :  { %896 = vmatpush.bf16.msra.mxu3 %v1483_v2 }
  0x42   :  { %473 = vmatpush.bf16.msra.mxu0 %v1141_v54 }
  0x43   :  { %487 = vmatpush.bf16.msra.mxu1 %v1145_v48 }
  0x44   :  { %883 = vmatpush.bf16.msra.mxu2 %v1474_v60 }
  0x46   :  { %474 = vmatpush.bf16.msra.mxu0 %v1101_v58  ;;  %v509_v58 = vperm.slane %v505_v39, 2 }
  0x47   :  { %488 = vmatpush.bf16.msra.mxu1 %v1105_v55  ;;  %v508_v55 = vperm.slane %v505_v39, 1 }
  0x48   :  { %884 = vmatpush.bf16.msra.mxu2 %v1473_v61 }
  0x49   :  { %1234 = vmatmul.msk.bf16.vlgmr.msra.gmra.mxu0 %vm351_vm0, %v1774_v49 }
  0x4a   :  { %1235 = vmatmul.msk.bf16.vlgmr.msra.gmra.mxu1 %vm351_vm0, %v1774_v49  ;;  %909 = vmatpush.bf16.msrb.mxu0 %v1492_v0  ;;  %v1482_v49 = vld [vmem:[#allocation8 + $0x68] sm:$0xff] }
  0x4b   :  { %897 = vmatpush.bf16.msra.mxu3 %v1482_v49  ;;  %923 = vmatpush.bf16.msrb.mxu1 %v1500_v7 }
  0x4c   :  { %885 = vmatpush.bf16.msra.mxu2 %v1472_v62 }
  0x4e   :  { %910 = vmatpush.bf16.msrb.mxu0 %v1491_v3 }
  0x4f   :  { %898 = vmatpush.bf16.msra.mxu3 %v1481_v9  ;;  %924 = vmatpush.bf16.msrb.mxu1 %v1499_v13 }
  0x50   :  { %886 = vmatpush.bf16.msra.mxu2 %v1471_v1 }
  0x52   :  { %911 = vmatpush.bf16.msrb.mxu0 %v1490_v5 }
  0x53   :  { %899 = vmatpush.bf16.msra.mxu3 %v1480_v15  ;;  %925 = vmatpush.bf16.msrb.mxu1 %v1498_v17 }
  0x54   :  { %887 = vmatpush.bf16.msra.mxu2 %v1470_v4 }
  0x56   :  { %912 = vmatpush.bf16.msrb.mxu0 %v1489_v10 }
  0x57   :  { %900 = vmatpush.bf16.msra.mxu3 %v1479_v22  ;;  %926 = vmatpush.bf16.msrb.mxu1 %v1497_v25 }
  0x58   :  { %888 = vmatpush.bf16.msra.mxu2 %v1469_v6 }
  0x5a   :  { %913 = vmatpush.bf16.msrb.mxu0 %v1488_v16  ;;  %v511_v16 = vperm.slane %v505_v39, 4 }
  0x5b   :  { %901 = vmatpush.bf16.msra.mxu3 %v1478_v27  ;;  %927 = vmatpush.bf16.msrb.mxu1 %v1496_v29 }
  0x5c   :  { %937 = vmatpush.bf16.msrb.mxu2 %v1508_v8  ;;  %v510_v8 = vperm.slane %v505_v39, 3 }
  0x5e   :  { %914 = vmatpush.bf16.msrb.mxu0 %v1487_v23 }
  0x5f   :  { %902 = vmatpush.bf16.msra.mxu3 %v1477_v33  ;;  %928 = vmatpush.bf16.msrb.mxu1 %v1495_v37 }
  0x60   :  { %938 = vmatpush.bf16.msrb.mxu2 %v1507_v14 }
  0x62   :  { %915 = vmatpush.bf16.msrb.mxu0 %v1486_v28 }
  0x63   :  { %929 = vmatpush.bf16.msrb.mxu1 %v1494_v40 }
  0x64   :  { %939 = vmatpush.bf16.msrb.mxu2 %v1506_v18 }
  0x66   :  { %916 = vmatpush.bf16.msrb.mxu0 %v1485_v34 }
  0x67   :  { %930 = vmatpush.bf16.msrb.mxu1 %v1493_v46  ;;  %v1515_v46 = vld [vmem:[#allocation10 + $0x30] sm:$0xff] }
  0x68   :  { %940 = vmatpush.bf16.msrb.mxu2 %v1505_v26 }
  0x6c   :  { %941 = vmatpush.bf16.msrb.mxu2 %v1504_v30 }
  0x70   :  { %942 = vmatpush.bf16.msrb.mxu2 %v1503_v38 }
  0x74   :  { %943 = vmatpush.bf16.msrb.mxu2 %v1502_v41 }
  0x78   :  { %944 = vmatpush.bf16.msrb.mxu2 %v1501_v47  ;;  %v1514_v47 = vld [vmem:[#allocation10 + $0x28] sm:$0xff] }
  0xa6   :  { %v364_v11 = vpop.f32.mrf.mxu0 }
  0xa7   :  { %v1796_v12 = vpop.f32.mrf.mxu1 }
  0xae   :  { %v1798_v19 = vpop.f32.mrf.mxu2  ;;  %v366_v21 = vpop.f32.mrf.mxu0 }
  0xaf   :  { %v1800_v20 = vpop.f32.mrf.mxu3  ;;  %v1802_v24 = vpop.f32.mrf.mxu1 }
  0xb6   :  { %v394_v31 = vpop.f32.mrf.mxu2  ;;  %v1806_v35 = vpop.f32.mrf.mxu0 }
  0xb7   :  { %v1804_v32 = vpop.f32.mrf.mxu3  ;;  %v434_v36 = vpop.f32.mrf.mxu1 }
  0xb8   :  { %v495_v42 = vmax.f32 %v364_v11, %v434_v36 }
  0xba   :  { %v517_v52 = vadd.f32 %v507_v43, %v495_v42 }
  0xbe   :  { %v448_v44 = vpop.f32.mrf.mxu2  ;;  %v422_v48 = vpop.f32.mrf.mxu0 }
  0xbf   :  { %v462_v45 = vpop.f32.mrf.mxu3  ;;  %v436_v50 = vpop.f32.mrf.mxu1  ;;  %v496_v54 = vmax.f32 %v1796_v12, %v448_v44 }
  0xc0   :  { %v500_v51 = vmax.f32 %v366_v21, %v436_v50  ;;  %v497_v57 = vmax.f32 %v1798_v19, %v462_v45  ;;  %v1516_v45 = vld [vmem:[#allocation10 + $0x38] sm:$0xff] }
  0xc1   :  { %v518_v3 = vadd.f32 %v508_v55, %v496_v54  ;;  %1025 = vmatpush.bf16.msrb.mxu3 %v1516_v45  ;;  %v1512_v50 = vld [vmem:[#allocation10 + $0x18] sm:$0xff]  ;;  %v1509_v54 = vld [vmem:[#allocation10] sm:$0xff] }
  0xc2   :  { %v522_v53 = vadd.f32 %v507_v43, %v500_v51  ;;  %v519_v4 = vadd.f32 %v509_v58, %v497_v57  ;;  %v1511_v51 = vld [vmem:[#allocation10 + $0x10] sm:$0xff] }
  0xc4   :  { %v527_v56 = vpack.c.bf16 %v522_v53, %v517_v52  ;;  %v1510_v53 = vld [vmem:[#allocation10 + $0x8] sm:$0xff] }
  0xc5   :  { %1026 = vmatpush.bf16.msrb.mxu3 %v1515_v46 }
  0xc6   :  { %v532_v59 = vunpack.c.l.bf16 %v527_v56  ;;  %v537_v60 = vunpack.c.h.bf16 %v527_v56  ;;  %v450_v61 = vpop.f32.mrf.mxu2  ;;  %v476_v1 = vpop.f32.mrf.mxu0 }
  0xc7   :  { %v464_v62 = vpop.f32.mrf.mxu3  ;;  %v501_v63 = vmax.f32 %v1802_v24, %v450_v61  ;;  %v490_v2 = vpop.f32.mrf.mxu1  ;;  %v498_v12 = vmax.f32 %v1800_v20, %v476_v1 }
  0xc8   :  { %v502_v0 = vmax.f32 %v394_v31, %v464_v62  ;;  %1531 = vtanh.f32 %v532_v59  ;;  %v499_v15 = vmax.f32 %v1806_v35, %v490_v2 }
  0xc9   :  { %1533 = vtanh.f32 %v537_v60  ;;  %v523_v49 = vadd.f32 %v508_v55, %v501_v63  ;;  %v520_v24 = vadd.f32 %v510_v8, %v498_v12  ;;  %1027 = vmatpush.bf16.msrb.mxu3 %v1514_v47 }
  0xca   :  { %v524_v5 = vadd.f32 %v509_v58, %v502_v0  ;;  %v521_v25 = vadd.f32 %v511_v16, %v499_v15  ;;  %v1529_v58 = vld [vmem:[%s1827_s4] ss:$0 sm:$0xff] }
  0xcb   :  { %v528_v6 = vpack.c.bf16 %v523_v49, %v518_v3 }
  0xcc   :  { %v529_v7 = vpack.c.bf16 %v524_v5, %v519_v4 }
  0xcd   :  { %v533_v9 = vunpack.c.l.bf16 %v528_v6  ;;  %v538_v10 = vunpack.c.h.bf16 %v528_v6 }
  0xce   :  { %v534_v11 = vunpack.c.l.bf16 %v529_v7  ;;  %v1532_v13 = vpop.eup %1531  ;;  %v539_v14 = vunpack.c.h.bf16 %v529_v7  ;;  %v478_v18 = vpop.f32.mrf.mxu0 }
  0xcf   :  { %v1534_v17 = vpop.eup %1533  ;;  %1535 = vtanh.f32 %v533_v9  ;;  %v492_v19 = vpop.f32.mrf.mxu1  ;;  %v503_v21 = vmax.f32 %v1804_v32, %v478_v18 }
  0xd0   :  { %1537 = vtanh.f32 %v538_v10  ;;  %v504_v22 = vmax.f32 %v422_v48, %v492_v19  ;;  %v552_v23 = vpack.c.bf16 %v1534_v17, %v1532_v13  ;;  %v1513_v48 = vld [vmem:[#allocation10 + $0x20] sm:$0xff] }
  0xd1   :  { %1539 = vtanh.f32 %v534_v11  ;;  %v525_v26 = vadd.f32 %v510_v8, %v503_v21  ;;  %1028 = vmatpush.bf16.msrb.mxu3 %v1513_v48 }
  0xd2   :  { %1541 = vtanh.f32 %v539_v14  ;;  %v526_v20 = vadd.f32 %v511_v16, %v504_v22  ;;  %889 = vmatmul.bf16.vlgmr.msra.gmra.mxu2 %v552_v23  ;;  %v1530_v16 = vld [vmem:[%s1829_s6] ss:$0 sm:$0xff] }
  0xd3   :  { %v530_v27 = vpack.c.bf16 %v525_v26, %v520_v24 }
  0xd4   :  { %v531_v28 = vpack.c.bf16 %v526_v20, %v521_v25 }
  0xd5   :  { %v1536_v29 = vpop.eup %1535  ;;  %v535_v31 = vunpack.c.l.bf16 %v530_v27  ;;  %v540_v33 = vunpack.c.h.bf16 %v530_v27  ;;  %1029 = vmatpush.bf16.msrb.mxu3 %v1512_v50 }
  0xd6   :  { %v1538_v30 = vpop.eup %1537  ;;  %v536_v34 = vunpack.c.l.bf16 %v531_v28  ;;  %v541_v36 = vunpack.c.h.bf16 %v531_v28 }
  0xd7   :  { %v1540_v35 = vpop.eup %1539  ;;  %v553_v37 = vpack.c.bf16 %v1538_v30, %v1536_v29  ;;  %1543 = vtanh.f32 %v535_v31 }
  0xd8   :  { %v1542_v32 = vpop.eup %1541  ;;  %1545 = vtanh.f32 %v540_v33 }
  0xd9   :  { %903 = vmatmul.bf16.vlgmr.msra.gmra.mxu3 %v553_v37  ;;  %v554_v38 = vpack.c.bf16 %v1542_v32, %v1540_v35  ;;  %1547 = vtanh.f32 %v536_v34 }
  0xda   :  { %1549 = vtanh.f32 %v541_v36  ;;  %1030 = vmatpush.bf16.msrb.mxu3 %v1511_v51 }
  0xdb   :  { %917 = vmatmul.bf16.vlgmr.msrb.gmra.mxu0 %v554_v38 }
  0xdd   :  { %v1544_v39 = vpop.eup %1543 }
  0xde   :  { %v1546_v40 = vpop.eup %1545  ;;  %1031 = vmatpush.bf16.msrb.mxu3 %v1510_v53 }
  0xdf   :  { %v1548_v41 = vpop.eup %1547  ;;  %v555_v42 = vpack.c.bf16 %v1546_v40, %v1544_v39 }
  0xe0   :  { %v1550_v43 = vpop.eup %1549 }
  0xe1   :  { %931 = vmatmul.bf16.vlgmr.msrb.gmra.mxu1 %v555_v42  ;;  %v556_v44 = vpack.c.bf16 %v1550_v43, %v1548_v41 }
  0xe2   :  { %1032 = vmatpush.bf16.msrb.mxu3 %v1509_v54 }
  0xe3   :  { %945 = vmatmul.bf16.vlgmr.msrb.gmra.mxu2 %v556_v44 }
 0x155   :  { %v890_v52 = vpop.f32.mrf.mxu2 }
 0x156   :  { %v891_v60 = vadd.f32 %v1529_v58, %v890_v52 }
 0x158   :  { %v918_v57 = vpop.f32.mrf.mxu0 }
 0x15c   :  { %v904_v55 = vpop.f32.mrf.mxu3 }
 0x15d   :  { %v892_v56 = vpop.f32.mrf.mxu2  ;;  %v905_v63 = vadd.f32 %v904_v55, %v891_v60 }
 0x15e   :  { %v932_v59 = vpop.f32.mrf.mxu1  ;;  %v893_v61 = vadd.f32 %v1529_v58, %v892_v56 }
 0x15f   :  { %v919_v3 = vadd.f32 %v918_v57, %v905_v63 }
 0x160   :  { %v920_v2 = vpop.f32.mrf.mxu0 }
 0x161   :  { %v933_v5 = vadd.f32 %v932_v59, %v919_v3 }
 0x164   :  { %v906_v62 = vpop.f32.mrf.mxu3 }
 0x165   :  { %v907_v0 = vadd.f32 %v906_v62, %v893_v61 }
 0x166   :  { %v946_v1 = vpop.f32.mrf.mxu2  ;;  %v934_v49 = vpop.f32.mrf.mxu1 }
 0x167   :  { %v921_v4 = vadd.f32 %v920_v2, %v907_v0  ;;  %v947_v8 = vadd.f32 %v946_v1, %v933_v5 }
 0x169   :  { %v935_v6 = vadd.f32 %v934_v49, %v921_v4 }
 0x16e   :  { %v948_v7 = vpop.f32.mrf.mxu2 }
 0x16f   :  { %v949_v9 = vadd.f32 %v948_v7, %v935_v6 }
 0x171   :  { %v951_v10 = vpack.c.bf16 %v949_v9, %v947_v8 }
 0x173   :  { %v952_v11 = vunpack.c.l.bf16 %v951_v10  ;;  %v953_v12 = vunpack.c.h.bf16 %v951_v10 }
 0x175   :  { %1551 = vtanh.f32 %v952_v11 }
 0x176   :  { %1553 = vtanh.f32 %v953_v12 }
 0x17b   :  { %v1552_v13 = vpop.eup %1551 }
 0x17c   :  { %v1554_v14 = vpop.eup %1553 }
 0x17d   :  { %v956_v15 = vpack.c.bf16 %v1554_v14, %v1552_v13 }
 0x17f   :  { %1033 = vmatmul.bf16.vlgmr.msrb.gmra.mxu3 %v956_v15 }
 0x202   :  { %v1034_v17 = vpop.f32.mrf.mxu3 }
 0x203   :  { %v1035_v18 = vadd.f32 %v1530_v16, %v1034_v17 }
 0x205   :  { %1039 = vst [vmem:[#allocation11] sm:$0xff] %v1035_v18 }
 0x20a   :  { %v1036_v19 = vpop.f32.mrf.mxu3 }
 0x20b   :  { %v1037_v21 = vadd.f32 %v1530_v16, %v1036_v19 }
 0x20d   :  { %1040 = vst [vmem:[#allocation11 + $0x8] sm:$0xff] %v1037_v21 }
 0x20e   :  { %1053 = dma.vmem_to_hbm [thread:$0]  %s1046_s29, 256, %s1048_s9, [#allocation4], %s1717_s10, %s1717_s10, %s1718_s11  }
 0x20f   :  { %1705 = dma.done.wait [#allocation4], 256  }
 0x210   :  { %1706 = vsyncadd [#allocation4], 4294967040 }
 0x211   :  { %1058 = vsyncpa [#allocation3], 1 }
 0x212   :  { %1059 = vsyncpa [#allocation6], 1 }
 0x213   :  { %1060 = vsyncpa [#allocation9], 1 }
 0x214   :  { %1061 = vsyncpa [#allocation4], 1 }

// kernel: tpu_custom_call.1
= control target key start
LH: loop header
LB: loop body
LE: loop exit
PB: predicated region body
PF: predicated region fallthrough
CT: control target
= control target key end

     0   :  { %12 = vsyncpa [#allocation3], 0  ;;  %s1790_s0 = inlined_call_operand.hbm [shape: bf16[16,64], index: 0, kind: input, shape index: {}]   ;;  %s1791_s1 = inlined_call_operand.hbm [shape: bf16[64,1280], index: 1, kind: input, shape index: {}]   ;;  %s1792_s2 = inlined_call_operand.hbm [shape: f32[1,640], index: 2, kind: input, shape index: {}]   ;;  %s1793_s3 = inlined_call_operand.hbm [shape: bf16[640,128], index: 3, kind: input, shape index: {}]   ;;  %s1794_s4 = inlined_call_operand.vmem [shape: f32[1,128], index: 4, kind: input, shape index: {}]   ;;  %s1795_s5 = inlined_call_operand.hbm [shape: bf16[128,128], index: 5, kind: input, shape index: {}]   ;;  %s1796_s6 = inlined_call_operand.vmem [shape: f32[1,128], index: 6, kind: input, shape index: {}]   ;;  %s1797_s7 = inlined_call_operand.hbm [shape: f32[16,128], index: 7, kind: output, shape index: {}]  }
   0x1   :  { %13 = vsyncpa [#allocation6], 0 }
   0x2   :  { %14 = vsyncpa [#allocation9], 0  ;;  %s33_s26 = sshll.u32 %s1791_s1, 4  ;;  %s34_s26 = int_to_ptr.hbm [resolvable:$true] %s33_s26 }
   0x3   :  { %15 = vsyncpa [#allocation4], 0  ;;  %s1689_s27 = smov [#allocation5]   ;;  %s1690_s29 = smov 640  }
   0x4   :  { %s35_s28 = sshll.u32 %s1689_s27, 4  ;;  %s1691_s30 = smov 40   ;;  %s36_s28 = int_to_ptr.vmem [resolvable:$true] %s35_s28 }
   0x5   :  { %41 = dma.hbm_to_vmem [thread:$0]  %s34_s26, 5120, %s36_s28, [#allocation6], %s1690_s29, %s1690_s29, %s1691_s30  }
   0x6   :  { %s57_s10 = sshll.u32 %s1793_s3, 4  ;;  %s1692_s11 = smov [#allocation8]   ;;  %s58_s10 = int_to_ptr.hbm [resolvable:$true] %s57_s10 }
   0x7   :  { %s59_s12 = sshll.u32 %s1692_s11, 4  ;;  %s20_s15 = sshll.u32 %s1790_s0, 4  ;;  %s60_s12 = int_to_ptr.vmem [resolvable:$true] %s59_s12  ;;  %s21_s15 = int_to_ptr.hbm [resolvable:$true] %s20_s15 }
   0x8   :  { %s1693_s1 = smov 64   ;;  %s1694_s16 = smov 4  }
   0x9   :  { %65 = dma.hbm_to_vmem [thread:$0]  %s58_s10, 5120, %s60_s12, [#allocation9], %s1693_s1, %s1693_s1, %s1694_s16  }
   0xa   :  { %s47_s19 = sshll.u32 %s1792_s2, 4  ;;  %s1695_s20 = smov [#allocation2]   ;;  %s48_s19 = int_to_ptr.hbm [resolvable:$true] %s47_s19 }
   0xb   :  { %s22_s21 = sshll.u32 %s1695_s20, 4  ;;  %s1696_s3 = smov [#allocation7]   ;;  %s23_s21 = int_to_ptr.vmem [resolvable:$true] %s22_s21 }
   0xc   :  { %28 = dma.hbm_to_vmem [thread:$0]  %s21_s15, 128, %s23_s21, [#allocation3], %s1693_s1, %s1693_s1, %s1694_s16  }
   0xd   :  { %s49_s22 = sshll.u32 %s1696_s3, 4  ;;  %s72_s0 = sshll.u32 %s1795_s5, 4  ;;  %s50_s22 = int_to_ptr.vmem [resolvable:$true] %s49_s22  ;;  %s73_s0 = int_to_ptr.hbm [resolvable:$true] %s72_s0 }
   0xe   :  { %52 = dma.hbm_to_vmem [thread:$0]  %s48_s19, 80, %s50_s22, [#allocation6]  }
   0xf   :  { %s1697_s25 = smov [#allocation10]  }
  0x10   :  { %s74_s26 = sshll.u32 %s1697_s25, 4  ;;  %s75_s26 = int_to_ptr.vmem [resolvable:$true] %s74_s26 }
  0x11   :  { %80 = dma.hbm_to_vmem [thread:$0]  %s73_s0, 1024, %s75_s26, [#allocation9], %s1693_s1, %s1693_s1, %s1694_s16  }
  0x12   :  { %1681 = dma.done.wait [#allocation3], 128  }
  0x13   :  { %1682 = vsyncadd [#allocation3], 4294967168 }
  0x14   :  { %1683 = dma.done.wait [#allocation6], 5200  }
  0x15   :  { %1684 = vsyncadd [#allocation6], 4294962096 }
  0x16   :  { %1685 = dma.done.wait [#allocation9], 6144  }
  0x17   :  { %1686 = vsyncadd [#allocation9], 4294961152  ;;  %v1170_v0 = vld [vmem:[#allocation5 + $0xf0] sm:$0xf]  ;;  %v1446_v1 = vld [vmem:[#allocation5 + $0x114] sm:$0xf0] }
  0x18   :  { %v1441_v2 = vld [vmem:[#allocation5 + $0xf4] sm:$0xf]  ;;  %v1171_v3 = vor.u32 %v1446_v1, %v1170_v0  ;;  %v1172_v4 = vld [vmem:[#allocation5 + $0x118] sm:$0xf0]  ;;  %v1178_v5 = vld [vmem:[#allocation5 + $0xf8] sm:$0xf] }
  0x19   :  { %v1447_v6 = vld [vmem:[#allocation5 + $0x11c] sm:$0xf0]  ;;  %v1175_v7 = vor.u32 %v1441_v2, %v1172_v4  ;;  %v1442_v9 = vld [vmem:[#allocation5 + $0xfc] sm:$0xf]  ;;  %v1180_v10 = vld [vmem:[#allocation5 + $0x120] sm:$0xf0] }
  0x1a   :  { %v1179_v8 = vor.u32 %v1447_v6, %v1178_v5  ;;  %v1130_v11 = vld [vmem:[#allocation5 + $0xa0] sm:$0xf]  ;;  %359 = vmatpush.bf16.msra.mxu0 %v1171_v3  ;;  %v1183_v12 = vor.u32 %v1442_v9, %v1180_v10  ;;  %v1436_v13 = vld [vmem:[#allocation5 + $0xc4] sm:$0xf0]  ;;  %v1431_v14 = vld [vmem:[#allocation5 + $0xa4] sm:$0xf] }
  0x1b   :  { %v1132_v15 = vld [vmem:[#allocation5 + $0xc8] sm:$0xf0]  ;;  %373 = vmatpush.bf16.msra.mxu1 %v1175_v7  ;;  %v1131_v16 = vor.u32 %v1436_v13, %v1130_v11  ;;  %v1138_v18 = vld [vmem:[#allocation5 + $0xa8] sm:$0xf]  ;;  %v1437_v19 = vld [vmem:[#allocation5 + $0xcc] sm:$0xf0] }
  0x1c   :  { %387 = vmatpush.bf16.msra.mxu2 %v1179_v8  ;;  %v1135_v17 = vor.u32 %v1431_v14, %v1132_v15  ;;  %v1432_v20 = vld [vmem:[#allocation5 + $0xac] sm:$0xf]  ;;  %401 = vmatpush.bf16.msra.mxu3 %v1183_v12  ;;  %v1139_v21 = vor.u32 %v1437_v19, %v1138_v18  ;;  %v1140_v22 = vld [vmem:[#allocation5 + $0xd0] sm:$0xf0]  ;;  %v1090_v23 = vld [vmem:[#allocation5 + $0x50] sm:$0xf] }
  0x1d   :  { %v1426_v24 = vld [vmem:[#allocation5 + $0x74] sm:$0xf0]  ;;  %v1143_v25 = vor.u32 %v1432_v20, %v1140_v22  ;;  %v1421_v26 = vld [vmem:[#allocation5 + $0x54] sm:$0xf]  ;;  %v1092_v27 = vld [vmem:[#allocation5 + $0x78] sm:$0xf0] }
  0x1e   :  { %v1098_v28 = vld [vmem:[#allocation5 + $0x58] sm:$0xf]  ;;  %360 = vmatpush.bf16.msra.mxu0 %v1131_v16  ;;  %v1091_v29 = vor.u32 %v1426_v24, %v1090_v23  ;;  %v1427_v30 = vld [vmem:[#allocation5 + $0x7c] sm:$0xf0]  ;;  %v1422_v31 = vld [vmem:[#allocation5 + $0x5c] sm:$0xf]  ;;  %v1095_v33 = vor.u32 %v1421_v26, %v1092_v27 }
  0x1f   :  { %v1100_v32 = vld [vmem:[#allocation5 + $0x80] sm:$0xf0]  ;;  %374 = vmatpush.bf16.msra.mxu1 %v1135_v17  ;;  %v1099_v34 = vor.u32 %v1427_v30, %v1098_v28  ;;  %v1050_v35 = vld [vmem:[#allocation5] sm:$0xf]  ;;  %v1416_v36 = vld [vmem:[#allocation5 + $0x24] sm:$0xf0] }
  0x20   :  { %388 = vmatpush.bf16.msra.mxu2 %v1139_v21  ;;  %v1411_v37 = vld [vmem:[#allocation5 + $0x4] sm:$0xf]  ;;  %402 = vmatpush.bf16.msra.mxu3 %v1143_v25  ;;  %v1103_v38 = vor.u32 %v1422_v31, %v1100_v32  ;;  %v1052_v39 = vld [vmem:[#allocation5 + $0x28] sm:$0xf0]  ;;  %v1058_v40 = vld [vmem:[#allocation5 + $0x8] sm:$0xf]  ;;  %v1051_v44 = vor.u32 %v1416_v36, %v1050_v35 }
  0x21   :  { %v1417_v41 = vld [vmem:[#allocation5 + $0x2c] sm:$0xf0]  ;;  %v1412_v42 = vld [vmem:[#allocation5 + $0xc] sm:$0xf]  ;;  %v1060_v43 = vld [vmem:[#allocation5 + $0x30] sm:$0xf0]  ;;  %v1055_v47 = vor.u32 %v1411_v37, %v1052_v39 }
  0x22   :  { %361 = vmatpush.bf16.msra.mxu0 %v1091_v29  ;;  %v1443_v45 = vld [vmem:[#allocation5 + $0x104] sm:$0xf]  ;;  %v1188_v46 = vld [vmem:[#allocation5 + $0x128] sm:$0xf0]  ;;  %v1059_v48 = vor.u32 %v1417_v41, %v1058_v40  ;;  %v1756_v49 = vld [vmem:[#allocation2] sm:$0xff]  ;;  %v1063_v52 = vor.u32 %v1412_v42, %v1060_v43  ;;  %vm351_vm0 = vcmask 523264  }
  0x23   :  { %375 = vmatpush.bf16.msra.mxu1 %v1095_v33  ;;  %v1194_v50 = vld [vmem:[#allocation5 + $0x108] sm:$0xf]  ;;  %v1449_v51 = vld [vmem:[#allocation5 + $0x12c] sm:$0xf0]  ;;  %v1191_v53 = vor.u32 %v1443_v45, %v1188_v46  ;;  %v1186_v54 = vld [vmem:[#allocation5 + $0x100] sm:$0xf] }
  0x24   :  { %389 = vmatpush.bf16.msra.mxu2 %v1099_v34  ;;  %403 = vmatpush.bf16.msra.mxu3 %v1103_v38  ;;  %v1448_v55 = vld [vmem:[#allocation5 + $0x124] sm:$0xf0]  ;;  %v1444_v56 = vld [vmem:[#allocation5 + $0x10c] sm:$0xf]  ;;  %v1195_v57 = vor.u32 %v1449_v51, %v1194_v50  ;;  %v1196_v58 = vld [vmem:[#allocation5 + $0x130] sm:$0xf0] }
  0x25   :  { %v1433_v59 = vld [vmem:[#allocation5 + $0xb4] sm:$0xf]  ;;  %v1148_v60 = vld [vmem:[#allocation5 + $0xd8] sm:$0xf0]  ;;  %v1154_v61 = vld [vmem:[#allocation5 + $0xb8] sm:$0xf]  ;;  %v1187_v63 = vor.u32 %v1448_v55, %v1186_v54  ;;  %v1199_v0 = vor.u32 %v1444_v56, %v1196_v58 }
  0x26   :  { %362 = vmatpush.bf16.msra.mxu0 %v1051_v44  ;;  %v1439_v62 = vld [vmem:[#allocation5 + $0xdc] sm:$0xf0]  ;;  %v1151_v1 = vor.u32 %v1433_v59, %v1148_v60  ;;  %v1146_v2 = vld [vmem:[#allocation5 + $0xb0] sm:$0xf]  ;;  %v1438_v3 = vld [vmem:[#allocation5 + $0xd4] sm:$0xf0] }
  0x27   :  { %376 = vmatpush.bf16.msra.mxu1 %v1055_v47  ;;  %v1434_v4 = vld [vmem:[#allocation5 + $0xbc] sm:$0xf]  ;;  %v1155_v5 = vor.u32 %v1439_v62, %v1154_v61  ;;  %v1156_v6 = vld [vmem:[#allocation5 + $0xe0] sm:$0xf0]  ;;  %v1108_v8 = vld [vmem:[#allocation5 + $0x88] sm:$0xf0]  ;;  %v1147_v11 = vor.u32 %v1438_v3, %v1146_v2 }
  0x28   :  { %390 = vmatpush.bf16.msra.mxu2 %v1059_v48  ;;  %404 = vmatpush.bf16.msra.mxu3 %v1063_v52  ;;  %v1423_v7 = vld [vmem:[#allocation5 + $0x64] sm:$0xf]  ;;  %v1114_v9 = vld [vmem:[#allocation5 + $0x68] sm:$0xf]  ;;  %v1429_v10 = vld [vmem:[#allocation5 + $0x8c] sm:$0xf0]  ;;  %v1159_v13 = vor.u32 %v1434_v4, %v1156_v6 }
  0x29   :  { %1208 = vmatmul.msk.bf16.vlgmr.msra.gmra.mxu0 %vm351_vm0, %v1756_v49  ;;  %v1106_v12 = vld [vmem:[#allocation5 + $0x60] sm:$0xf]  ;;  %v1111_v14 = vor.u32 %v1423_v7, %v1108_v8  ;;  %v1428_v15 = vld [vmem:[#allocation5 + $0x84] sm:$0xf0]  ;;  %v1424_v16 = vld [vmem:[#allocation5 + $0x6c] sm:$0xf]  ;;  %v1115_v18 = vor.u32 %v1429_v10, %v1114_v9 }
  0x2a   :  { %1209 = vmatmul.msk.bf16.vlgmr.msra.gmra.mxu1 %vm351_vm0, %v1756_v49  ;;  %415 = vmatpush.bf16.msrb.mxu0 %v1187_v63  ;;  %v1116_v17 = vld [vmem:[#allocation5 + $0x90] sm:$0xf0]  ;;  %v1068_v20 = vld [vmem:[#allocation5 + $0x38] sm:$0xf0]  ;;  %v1074_v21 = vld [vmem:[#allocation5 + $0x18] sm:$0xf]  ;;  %v1107_v25 = vor.u32 %v1428_v15, %v1106_v12 }
  0x2b   :  { %429 = vmatpush.bf16.msrb.mxu1 %v1191_v53  ;;  %1210 = vmatmul.msk.bf16.vlgmr.msra.gmra.mxu2 %vm351_vm0, %v1756_v49  ;;  %v1413_v19 = vld [vmem:[#allocation5 + $0x14] sm:$0xf]  ;;  %v1419_v22 = vld [vmem:[#allocation5 + $0x3c] sm:$0xf0]  ;;  %v1204_v24 = vld [vmem:[#allocation5 + $0x138] sm:$0xf0]  ;;  %v1119_v27 = vor.u32 %v1424_v16, %v1116_v17 }
  0x2c   :  { %443 = vmatpush.bf16.msrb.mxu2 %v1195_v57  ;;  %1211 = vmatmul.msk.bf16.vlgmr.msra.gmra.mxu3 %vm351_vm0, %v1756_v49  ;;  %v1445_v23 = vld [vmem:[#allocation5 + $0x114] sm:$0xf]  ;;  %v1066_v26 = vld [vmem:[#allocation5 + $0x10] sm:$0xf]  ;;  %v1071_v28 = vor.u32 %v1413_v19, %v1068_v20  ;;  %v1418_v29 = vld [vmem:[#allocation5 + $0x34] sm:$0xf0]  ;;  %v1075_v32 = vor.u32 %v1419_v22, %v1074_v21 }
  0x2d   :  { %457 = vmatpush.bf16.msrb.mxu3 %v1199_v0  ;;  %v1414_v30 = vld [vmem:[#allocation5 + $0x1c] sm:$0xf]  ;;  %v1076_v31 = vld [vmem:[#allocation5 + $0x40] sm:$0xf0]  ;;  %v1207_v33 = vor.u32 %v1445_v23, %v1204_v24  ;;  %v1202_v34 = vld [vmem:[#allocation5 + $0x110] sm:$0xf]  ;;  %v1067_v39 = vor.u32 %v1418_v29, %v1066_v26 }
  0x2e   :  { %416 = vmatpush.bf16.msrb.mxu0 %v1147_v11  ;;  %v1450_v35 = vld [vmem:[#allocation5 + $0x134] sm:$0xf0]  ;;  %v1435_v36 = vld [vmem:[#allocation5 + $0xc4] sm:$0xf]  ;;  %v1164_v37 = vld [vmem:[#allocation5 + $0xe8] sm:$0xf0]  ;;  %v1079_v40 = vor.u32 %v1414_v30, %v1076_v31 }
  0x2f   :  { %430 = vmatpush.bf16.msrb.mxu1 %v1151_v1  ;;  %v1458_v38 = vld [vmem:[#allocation8 + $0x38] sm:$0xff]  ;;  %v1203_v41 = vor.u32 %v1450_v35, %v1202_v34  ;;  %v1167_v42 = vor.u32 %v1435_v36, %v1164_v37  ;;  %v1440_v44 = vld [vmem:[#allocation5 + $0xe4] sm:$0xf0]  ;;  %v1425_v45 = vld [vmem:[#allocation5 + $0x74] sm:$0xf]  ;;  %s1698_s28 = smov [#allocation11]  }
  0x30   :  { %444 = vmatpush.bf16.msrb.mxu2 %v1155_v5  ;;  %v1162_v43 = vld [vmem:[#allocation5 + $0xc0] sm:$0xf]  ;;  %v1124_v46 = vld [vmem:[#allocation5 + $0x98] sm:$0xf0]  ;;  %v1122_v51 = vld [vmem:[#allocation5 + $0x70] sm:$0xf] }
  0x31   :  { %458 = vmatpush.bf16.msrb.mxu3 %v1159_v13  ;;  %v1163_v47 = vor.u32 %v1440_v44, %v1162_v43  ;;  %v1457_v48 = vld [vmem:[#allocation8 + $0x30] sm:$0xff]  ;;  %v1127_v50 = vor.u32 %v1425_v45, %v1124_v46  ;;  %v1415_v53 = vld [vmem:[#allocation5 + $0x24] sm:$0xf]  ;;  %v1084_v54 = vld [vmem:[#allocation5 + $0x48] sm:$0xf0]  ;;  %s1027_s29 = sshll.u32 %s1698_s28, 4  ;;  %s1028_s29 = int_to_ptr.vmem [resolvable:$true] %s1027_s29 }
  0x32   :  { %417 = vmatpush.bf16.msrb.mxu0 %v1107_v25  ;;  %v1430_v52 = vld [vmem:[#allocation5 + $0x94] sm:$0xf0]  ;;  %v1087_v56 = vor.u32 %v1415_v53, %v1084_v54  ;;  %v1082_v57 = vld [vmem:[#allocation5 + $0x20] sm:$0xf]  ;;  %v1420_v58 = vld [vmem:[#allocation5 + $0x44] sm:$0xf0] }
  0x33   :  { %431 = vmatpush.bf16.msrb.mxu1 %v1111_v14  ;;  %v1123_v55 = vor.u32 %v1430_v52, %v1122_v51  ;;  %v1083_v59 = vor.u32 %v1420_v58, %v1082_v57  ;;  %v1456_v60 = vld [vmem:[#allocation8 + $0x28] sm:$0xff]  ;;  %v1455_v61 = vld [vmem:[#allocation8 + $0x20] sm:$0xff]  ;;  %v1454_v62 = vld [vmem:[#allocation8 + $0x18] sm:$0xff]  ;;  %s1029_s9 = sshll.u32 %s1797_s7, 4  ;;  %s1699_s10 = smov 128   ;;  %s1030_s9 = int_to_ptr.hbm [resolvable:$true] %s1029_s9 }
  0x34   :  { %445 = vmatpush.bf16.msrb.mxu2 %v1115_v18  ;;  %v1466_v63 = vld [vmem:[#allocation8 + $0x78] sm:$0xff]  ;;  %v1453_v1 = vld [vmem:[#allocation8 + $0x10] sm:$0xff]  ;;  %v1452_v4 = vld [vmem:[#allocation8 + $0x8] sm:$0xff]  ;;  %s1700_s11 = smov 8  }
  0x35   :  { %459 = vmatpush.bf16.msrb.mxu3 %v1119_v27  ;;  %v1474_v0 = vld [vmem:[#allocation8 + $0xb8] sm:$0xff]  ;;  %v1465_v2 = vld [vmem:[#allocation8 + $0x70] sm:$0xff]  ;;  %v1464_v5 = vld [vmem:[#allocation8 + $0x68] sm:$0xff] }
  0x36   :  { %418 = vmatpush.bf16.msrb.mxu0 %v1067_v39  ;;  %v1473_v3 = vld [vmem:[#allocation8 + $0xb0] sm:$0xff]  ;;  %v1451_v6 = vld [vmem:[#allocation8] sm:$0xff]  ;;  %v1482_v7 = vld [vmem:[#allocation8 + $0xf8] sm:$0xff] }
  0x37   :  { %432 = vmatpush.bf16.msrb.mxu1 %v1071_v28  ;;  %v1490_v8 = vld [vmem:[#allocation8 + $0x138] sm:$0xff]  ;;  %v1463_v9 = vld [vmem:[#allocation8 + $0x60] sm:$0xff]  ;;  %v1481_v11 = vld [vmem:[#allocation8 + $0xf0] sm:$0xff] }
  0x38   :  { %446 = vmatpush.bf16.msrb.mxu2 %v1075_v32  ;;  %v1471_v10 = vld [vmem:[#allocation8 + $0xa0] sm:$0xff]  ;;  %v1489_v12 = vld [vmem:[#allocation8 + $0x130] sm:$0xff]  ;;  %v1462_v13 = vld [vmem:[#allocation8 + $0x58] sm:$0xff] }
  0x39   :  { %460 = vmatpush.bf16.msrb.mxu3 %v1079_v40  ;;  %1212 = vmatmul.msk.bf16.vlgmr.msrb.gmra.mxu0 %vm351_vm0, %v1756_v49  ;;  %v1470_v14 = vld [vmem:[#allocation8 + $0x98] sm:$0xff]  ;;  %v1480_v16 = vld [vmem:[#allocation8 + $0xe8] sm:$0xff]  ;;  %v1461_v19 = vld [vmem:[#allocation8 + $0x50] sm:$0xff] }
  0x3a   :  { %471 = vmatpush.bf16.msra.mxu0 %v1203_v41  ;;  %1213 = vmatmul.msk.bf16.vlgmr.msrb.gmra.mxu1 %vm351_vm0, %v1756_v49  ;;  %v1488_v17 = vld [vmem:[#allocation8 + $0x128] sm:$0xff]  ;;  %v1469_v20 = vld [vmem:[#allocation8 + $0x90] sm:$0xff]  ;;  %v1479_v21 = vld [vmem:[#allocation8 + $0xe0] sm:$0xff] }
  0x3b   :  { %485 = vmatpush.bf16.msra.mxu1 %v1207_v33  ;;  %1214 = vmatmul.msk.bf16.vlgmr.msrb.gmra.mxu2 %vm351_vm0, %v1756_v49  ;;  %v1487_v22 = vld [vmem:[#allocation8 + $0x120] sm:$0xff]  ;;  %v1460_v23 = vld [vmem:[#allocation8 + $0x48] sm:$0xff]  ;;  %v1478_v28 = vld [vmem:[#allocation8 + $0xd8] sm:$0xff] }
  0x3c   :  { %866 = vmatpush.bf16.msra.mxu2 %v1458_v38  ;;  %1215 = vmatmul.msk.bf16.vlgmr.msrb.gmra.mxu3 %vm351_vm0, %v1756_v49  ;;  %v1468_v24 = vld [vmem:[#allocation8 + $0x88] sm:$0xff]  ;;  %v1486_v29 = vld [vmem:[#allocation8 + $0x118] sm:$0xff]  ;;  %v1459_v31 = vld [vmem:[#allocation8 + $0x40] sm:$0xff] }
  0x3d   :  { %880 = vmatpush.bf16.msra.mxu3 %v1466_v63  ;;  %v1467_v32 = vld [vmem:[#allocation8 + $0x80] sm:$0xff]  ;;  %v1477_v33 = vld [vmem:[#allocation8 + $0xd0] sm:$0xff]  ;;  %v1476_v36 = vld [vmem:[#allocation8 + $0xc8] sm:$0xff] }
  0x3e   :  { %472 = vmatpush.bf16.msra.mxu0 %v1163_v47  ;;  %v1485_v34 = vld [vmem:[#allocation8 + $0x110] sm:$0xff]  ;;  %v1484_v37 = vld [vmem:[#allocation8 + $0x108] sm:$0xff]  ;;  %v1475_v41 = vld [vmem:[#allocation8 + $0xc0] sm:$0xff] }
  0x3f   :  { %486 = vmatpush.bf16.msra.mxu1 %v1167_v42  ;;  %v1483_v42 = vld [vmem:[#allocation8 + $0x100] sm:$0xff]  ;;  %v505_v43 = vld [vmem:[#allocation7] sm:$0x1f] }
  0x40   :  { %867 = vmatpush.bf16.msra.mxu2 %v1457_v48  ;;  %v507_v45 = vperm.slane %v505_v43, 0  ;;  %v508_v54 = vperm.slane %v505_v43, 1 }
  0x41   :  { %881 = vmatpush.bf16.msra.mxu3 %v1465_v2 }
  0x42   :  { %473 = vmatpush.bf16.msra.mxu0 %v1123_v55 }
  0x43   :  { %487 = vmatpush.bf16.msra.mxu1 %v1127_v50 }
  0x44   :  { %868 = vmatpush.bf16.msra.mxu2 %v1456_v60 }
  0x45   :  { %882 = vmatpush.bf16.msra.mxu3 %v1464_v5 }
  0x46   :  { %474 = vmatpush.bf16.msra.mxu0 %v1083_v59 }
  0x47   :  { %488 = vmatpush.bf16.msra.mxu1 %v1087_v56  ;;  %v509_v56 = vperm.slane %v505_v43, 2 }
  0x48   :  { %869 = vmatpush.bf16.msra.mxu2 %v1455_v61 }
  0x49   :  { %1216 = vmatmul.msk.bf16.vlgmr.msra.gmra.mxu0 %vm351_vm0, %v1756_v49  ;;  %883 = vmatpush.bf16.msra.mxu3 %v1463_v9 }
  0x4a   :  { %1217 = vmatmul.msk.bf16.vlgmr.msra.gmra.mxu1 %vm351_vm0, %v1756_v49  ;;  %894 = vmatpush.bf16.msrb.mxu0 %v1474_v0  ;;  %v1472_v49 = vld [vmem:[#allocation8 + $0xa8] sm:$0xff] }
  0x4b   :  { %908 = vmatpush.bf16.msrb.mxu1 %v1482_v7 }
  0x4c   :  { %870 = vmatpush.bf16.msra.mxu2 %v1454_v62 }
  0x4d   :  { %884 = vmatpush.bf16.msra.mxu3 %v1462_v13 }
  0x4e   :  { %895 = vmatpush.bf16.msrb.mxu0 %v1473_v3 }
  0x4f   :  { %909 = vmatpush.bf16.msrb.mxu1 %v1481_v11 }
  0x50   :  { %871 = vmatpush.bf16.msra.mxu2 %v1453_v1 }
  0x51   :  { %885 = vmatpush.bf16.msra.mxu3 %v1461_v19 }
  0x52   :  { %896 = vmatpush.bf16.msrb.mxu0 %v1472_v49  ;;  %v510_v49 = vperm.slane %v505_v43, 3 }
  0x53   :  { %910 = vmatpush.bf16.msrb.mxu1 %v1480_v16 }
  0x54   :  { %872 = vmatpush.bf16.msra.mxu2 %v1452_v4 }
  0x55   :  { %886 = vmatpush.bf16.msra.mxu3 %v1460_v23 }
  0x56   :  { %897 = vmatpush.bf16.msrb.mxu0 %v1471_v10 }
  0x57   :  { %911 = vmatpush.bf16.msrb.mxu1 %v1479_v21 }
  0x58   :  { %873 = vmatpush.bf16.msra.mxu2 %v1451_v6 }
  0x59   :  { %887 = vmatpush.bf16.msra.mxu3 %v1459_v31  ;;  %v1497_v31 = vld [vmem:[#allocation10 + $0x30] sm:$0xff] }
  0x5a   :  { %898 = vmatpush.bf16.msrb.mxu0 %v1470_v14 }
  0x5b   :  { %912 = vmatpush.bf16.msrb.mxu1 %v1478_v28 }
  0x5c   :  { %922 = vmatpush.bf16.msrb.mxu2 %v1490_v8  ;;  %v511_v8 = vperm.slane %v505_v43, 4 }
  0x5e   :  { %899 = vmatpush.bf16.msrb.mxu0 %v1469_v20 }
  0x5f   :  { %913 = vmatpush.bf16.msrb.mxu1 %v1477_v33  ;;  %v1495_v33 = vld [vmem:[#allocation10 + $0x20] sm:$0xff] }
  0x60   :  { %923 = vmatpush.bf16.msrb.mxu2 %v1489_v12 }
  0x62   :  { %900 = vmatpush.bf16.msrb.mxu0 %v1468_v24 }
  0x63   :  { %914 = vmatpush.bf16.msrb.mxu1 %v1476_v36  ;;  %v1492_v36 = vld [vmem:[#allocation10 + $0x8] sm:$0xff] }
  0x64   :  { %924 = vmatpush.bf16.msrb.mxu2 %v1488_v17 }
  0x66   :  { %901 = vmatpush.bf16.msrb.mxu0 %v1467_v32  ;;  %v1496_v32 = vld [vmem:[#allocation10 + $0x28] sm:$0xff] }
  0x67   :  { %915 = vmatpush.bf16.msrb.mxu1 %v1475_v41 }
  0x68   :  { %925 = vmatpush.bf16.msrb.mxu2 %v1487_v22 }
  0x6c   :  { %926 = vmatpush.bf16.msrb.mxu2 %v1486_v29 }
  0x70   :  { %927 = vmatpush.bf16.msrb.mxu2 %v1485_v34  ;;  %v1494_v34 = vld [vmem:[#allocation10 + $0x18] sm:$0xff] }
  0x74   :  { %928 = vmatpush.bf16.msrb.mxu2 %v1484_v37  ;;  %v1491_v37 = vld [vmem:[#allocation10] sm:$0xff] }
  0x78   :  { %929 = vmatpush.bf16.msrb.mxu2 %v1483_v42 }
  0xa6   :  { %v364_v15 = vpop.f32.mrf.mxu0 }
  0xa7   :  { %v378_v18 = vpop.f32.mrf.mxu1 }
  0xae   :  { %v392_v25 = vpop.f32.mrf.mxu2  ;;  %v366_v27 = vpop.f32.mrf.mxu0 }
  0xaf   :  { %v1778_v26 = vpop.f32.mrf.mxu3  ;;  %v380_v30 = vpop.f32.mrf.mxu1 }
  0xb6   :  { %v394_v35 = vpop.f32.mrf.mxu2  ;;  %v420_v39 = vpop.f32.mrf.mxu0 }
  0xb7   :  { %v408_v38 = vpop.f32.mrf.mxu3  ;;  %v434_v40 = vpop.f32.mrf.mxu1 }
  0xb8   :  { %v495_v44 = vmax.f32 %v364_v15, %v434_v40 }
  0xba   :  { %v517_v51 = vadd.f32 %v507_v45, %v495_v44 }
  0xbc   :  { %1513 = vtanh.f32 %v517_v51 }
  0xbe   :  { %v448_v46 = vpop.f32.mrf.mxu2  ;;  %v422_v48 = vpop.f32.mrf.mxu0 }
  0xbf   :  { %v462_v47 = vpop.f32.mrf.mxu3  ;;  %v436_v50 = vpop.f32.mrf.mxu1  ;;  %v496_v53 = vmax.f32 %v378_v18, %v448_v46 }
  0xc0   :  { %v500_v52 = vmax.f32 %v366_v27, %v436_v50  ;;  %v497_v55 = vmax.f32 %v392_v25, %v462_v47 }
  0xc1   :  { %v518_v58 = vadd.f32 %v508_v54, %v496_v53 }
  0xc2   :  { %v522_v57 = vadd.f32 %v507_v45, %v500_v52  ;;  %v519_v59 = vadd.f32 %v509_v56, %v497_v55  ;;  %v1514_v4 = vpop.eup %1513 }
  0xc4   :  { %1515 = vtanh.f32 %v522_v57 }
  0xc5   :  { %1517 = vtanh.f32 %v518_v58 }
  0xc6   :  { %v450_v60 = vpop.f32.mrf.mxu2  ;;  %v476_v0 = vpop.f32.mrf.mxu0  ;;  %1519 = vtanh.f32 %v519_v59 }
  0xc7   :  { %v464_v61 = vpop.f32.mrf.mxu3  ;;  %v501_v62 = vmax.f32 %v380_v30, %v450_v60  ;;  %v490_v1 = vpop.f32.mrf.mxu1  ;;  %v498_v5 = vmax.f32 %v1778_v26, %v476_v0  ;;  %v1498_v30 = vld [vmem:[#allocation10 + $0x38] sm:$0xff] }
  0xc8   :  { %v502_v63 = vmax.f32 %v394_v35, %v464_v61  ;;  %v499_v7 = vmax.f32 %v420_v39, %v490_v1  ;;  %1007 = vmatpush.bf16.msrb.mxu3 %v1498_v30  ;;  %v1493_v35 = vld [vmem:[#allocation10 + $0x10] sm:$0xff] }
  0xc9   :  { %v523_v2 = vadd.f32 %v508_v54, %v501_v62  ;;  %v520_v10 = vadd.f32 %v510_v49, %v498_v5  ;;  %v1511_v39 = vld [vmem:[%s1794_s4] ss:$0 sm:$0xff] }
  0xca   :  { %v524_v3 = vadd.f32 %v509_v56, %v502_v63  ;;  %v1516_v6 = vpop.eup %1515  ;;  %v521_v12 = vadd.f32 %v511_v8, %v499_v7  ;;  %v1512_v63 = vld [vmem:[%s1796_s6] ss:$0 sm:$0xff] }
  0xcb   :  { %1521 = vtanh.f32 %v523_v2  ;;  %v537_v9 = vpack.c.bf16 %v1516_v6, %v1514_v4  ;;  %v1518_v11 = vpop.eup %1517 }
  0xcc   :  { %1523 = vtanh.f32 %v524_v3  ;;  %v1520_v15 = vpop.eup %1519  ;;  %1008 = vmatpush.bf16.msrb.mxu3 %v1497_v31 }
  0xcd   :  { %874 = vmatmul.bf16.vlgmr.msra.gmra.mxu2 %v537_v9  ;;  %1525 = vtanh.f32 %v520_v10 }
  0xce   :  { %v478_v13 = vpop.f32.mrf.mxu0  ;;  %1527 = vtanh.f32 %v521_v12 }
  0xcf   :  { %v492_v14 = vpop.f32.mrf.mxu1  ;;  %v503_v16 = vmax.f32 %v408_v38, %v478_v13 }
  0xd0   :  { %v504_v17 = vmax.f32 %v422_v48, %v492_v14  ;;  %1009 = vmatpush.bf16.msrb.mxu3 %v1496_v32 }
  0xd1   :  { %v1522_v18 = vpop.eup %1521  ;;  %v525_v20 = vadd.f32 %v510_v49, %v503_v16 }
  0xd2   :  { %v1524_v19 = vpop.eup %1523  ;;  %v526_v21 = vadd.f32 %v511_v8, %v504_v17  ;;  %v538_v22 = vpack.c.bf16 %v1522_v18, %v1518_v11 }
  0xd3   :  { %v539_v23 = vpack.c.bf16 %v1524_v19, %v1520_v15  ;;  %1529 = vtanh.f32 %v525_v20  ;;  %v1526_v24 = vpop.eup %1525 }
  0xd4   :  { %888 = vmatmul.bf16.vlgmr.msra.gmra.mxu3 %v538_v22  ;;  %1531 = vtanh.f32 %v526_v21  ;;  %v1528_v25 = vpop.eup %1527 }
  0xd5   :  { %902 = vmatmul.bf16.vlgmr.msrb.gmra.mxu0 %v539_v23  ;;  %1010 = vmatpush.bf16.msrb.mxu3 %v1495_v33 }
  0xd9   :  { %v1530_v26 = vpop.eup %1529  ;;  %1011 = vmatpush.bf16.msrb.mxu3 %v1494_v34 }
  0xda   :  { %v1532_v27 = vpop.eup %1531  ;;  %v540_v28 = vpack.c.bf16 %v1530_v26, %v1526_v24 }
  0xdb   :  { %v541_v29 = vpack.c.bf16 %v1532_v27, %v1528_v25 }
  0xdc   :  { %916 = vmatmul.bf16.vlgmr.msrb.gmra.mxu1 %v540_v28 }
  0xdd   :  { %930 = vmatmul.bf16.vlgmr.msrb.gmra.mxu2 %v541_v29  ;;  %1012 = vmatpush.bf16.msrb.mxu3 %v1493_v35 }
  0xe1   :  { %1013 = vmatpush.bf16.msrb.mxu3 %v1492_v36 }
  0xe5   :  { %1014 = vmatpush.bf16.msrb.mxu3 %v1491_v37 }
 0x150   :  { %v875_v38 = vpop.f32.mrf.mxu2 }
 0x151   :  { %v876_v43 = vadd.f32 %v1511_v39, %v875_v38 }
 0x152   :  { %v903_v41 = vpop.f32.mrf.mxu0 }
 0x157   :  { %v889_v40 = vpop.f32.mrf.mxu3 }
 0x158   :  { %v877_v42 = vpop.f32.mrf.mxu2  ;;  %v890_v45 = vadd.f32 %v889_v40, %v876_v43 }
 0x159   :  { %v917_v44 = vpop.f32.mrf.mxu1  ;;  %v878_v46 = vadd.f32 %v1511_v39, %v877_v42 }
 0x15a   :  { %v904_v50 = vadd.f32 %v903_v41, %v890_v45  ;;  %v905_v52 = vpop.f32.mrf.mxu0 }
 0x15c   :  { %v918_v54 = vadd.f32 %v917_v44, %v904_v50 }
 0x15f   :  { %v891_v47 = vpop.f32.mrf.mxu3 }
 0x160   :  { %v892_v48 = vadd.f32 %v891_v47, %v878_v46  ;;  %v931_v51 = vpop.f32.mrf.mxu2 }
 0x161   :  { %v919_v55 = vpop.f32.mrf.mxu1  ;;  %v932_v56 = vadd.f32 %v931_v51, %v918_v54 }
 0x162   :  { %v906_v53 = vadd.f32 %v905_v52, %v892_v48 }
 0x163   :  { %1533 = vtanh.f32 %v932_v56 }
 0x164   :  { %v920_v57 = vadd.f32 %v919_v55, %v906_v53 }
 0x168   :  { %v933_v58 = vpop.f32.mrf.mxu2 }
 0x169   :  { %v934_v59 = vadd.f32 %v933_v58, %v920_v57  ;;  %v1534_v60 = vpop.eup %1533 }
 0x16b   :  { %1535 = vtanh.f32 %v934_v59 }
 0x171   :  { %v1536_v61 = vpop.eup %1535 }
 0x172   :  { %v938_v62 = vpack.c.bf16 %v1536_v61, %v1534_v60 }
 0x174   :  { %1015 = vmatmul.bf16.vlgmr.msrb.gmra.mxu3 %v938_v62 }
 0x1f7   :  { %v1016_v0 = vpop.f32.mrf.mxu3 }
 0x1f8   :  { %v1017_v1 = vadd.f32 %v1512_v63, %v1016_v0 }
 0x1fa   :  { %1021 = vst [vmem:[#allocation11] sm:$0xff] %v1017_v1 }
 0x1ff   :  { %v1018_v2 = vpop.f32.mrf.mxu3 }
 0x200   :  { %v1019_v3 = vadd.f32 %v1512_v63, %v1018_v2 }
 0x202   :  { %1022 = vst [vmem:[#allocation11 + $0x8] sm:$0xff] %v1019_v3 }
 0x203   :  { %1035 = dma.vmem_to_hbm [thread:$0]  %s1028_s29, 256, %s1030_s9, [#allocation4], %s1699_s10, %s1699_s10, %s1700_s11  }
 0x204   :  { %1687 = dma.done.wait [#allocation4], 256  }
 0x205   :  { %1688 = vsyncadd [#allocation4], 4294967040 }
 0x206   :  { %1040 = vsyncpa [#allocation3], 1 }
 0x207   :  { %1041 = vsyncpa [#allocation6], 1 }
 0x208   :  { %1042 = vsyncpa [#allocation9], 1 }
 0x209   :  { %1043 = vsyncpa [#allocation4], 1 }

</bundles_post_ra>
